<compile_context>
chip_gen: v7x
topology: tpu7x:2x2x1
jax: 0.10.0
libtpu: 0.0.40
codegen_flags: <defaults>
</compile_context>

<pallas_src>
import jax
import jax.numpy as jnp
from jax import lax
from jax.experimental import pallas as pl
from jax.experimental.pallas import tpu as pltpu

# ----- sizes (small, consistent with the module's forward) -----
D_MODEL = 32                    # input_size
NUM_OUT = 8                     # num_output
SEQ_LEN = 16                    # L (x viewed as (1, L, d_model))
D_STATE = 16
D_CONV = 4
EXPAND = 2
D_INNER = EXPAND * D_MODEL                 # 64
DT_RANK = max(1, -(-D_MODEL // 16))        # ceil(d_model/16) = 2
HALF = D_STATE // 2                        # 8  (folded-state sublanes)
LANES = 2 * D_INNER                        # 128 (folded-state lanes)

# packed parameter slab layout (rows x 128 lanes, f32)
_ROW_A = 0          # [ 0: 8, 0:128]  -exp(A_log), folded to (8,128)
_ROW_MASK = 8       # [ 8:40, 0:128]  block-diag mask for deferred C contraction
_ROW_WCOMB = 40     # [40:48, 0: 64]  w_lin @ w_out
_ROW_CONV = 48      # [48:52, 0: 64]  conv taps ; [48:52, 64:128] = [conv_b, dt_b, D, b_lin]
SLAB_ROWS = 56


def _sigmoid(v):
    return pl.reciprocal(1.0 + jnp.exp(-v), approx=True)


def _silu(v):
    return v * _sigmoid(v)


def _softplus(v):
    return jnp.where(v > 20.0, v, jnp.log1p(jnp.exp(jnp.minimum(v, 20.0))))


def mamba_kernel(x_ref, w_in_ref, w_xp_ref, slab_ref, o_ref, dA_s, dBu_s, h_s):
    f32 = jnp.float32
    bf16 = jnp.bfloat16
    dn_t = (((1,), (1,)), ((), ()))   # "x @ W.T"  (weights stored (out, in))
    dn_s = (((1,), (0,)), ((), ()))   # "A @ B"

    L, DI, DS = SEQ_LEN, D_INNER, D_STATE
    xv = x_ref[...]                                                       # (L, d_model) f32

    # ---- fused in-projection: x-branch | z-branch | residual @ w_lin.T, one bf16 matmul ----
    xz = lax.dot_general(xv.astype(bf16), w_in_ref[...], dn_t,
                         preferred_element_type=f32)                      # (L, 2*DI + NUM_OUT)
    xin = xz[:, :DI]
    zv = xz[:, DI:2 * DI]
    res_lin = xz[:, 2 * DI:2 * DI + NUM_OUT]                              # x @ w_lin.T

    # ---- causal depthwise conv1d (4 taps, left pad) + SiLU ----
    row = lax.broadcasted_iota(jnp.int32, (L, DI), 0)
    acc = jnp.zeros((L, DI), f32) + slab_ref[_ROW_CONV:_ROW_CONV + 1, 64:128]   # conv bias
    for k in range(D_CONV):                                  # static 4 taps
        shift = D_CONV - 1 - k
        if shift == 0:
            shifted = xin
        else:
            shifted = pltpu.roll(xin, shift, axis=0)
            shifted = jnp.where(row >= shift, shifted, 0.0)
        acc = acc + shifted * slab_ref[_ROW_CONV + k:_ROW_CONV + k + 1, 0:64]
    xc = _silu(acc)                                                        # (L, DI) f32

    # ---- fused x_proj + dt_proj (low-rank fold): one bf16 matmul -> [dt_pre | B | C] ----
    proj = lax.dot_general(xc.astype(bf16), w_xp_ref[...], dn_t,
                           preferred_element_type=f32)                     # (L, DI + 2*DS)
    dt = _softplus(proj[:, :DI] + slab_ref[_ROW_CONV + 1:_ROW_CONV + 2, 64:128])
    bm = proj[:, DI:DI + DS]                                               # (L, DS)
    cm = proj[:, DI + DS:DI + 2 * DS]                                      # (L, DS)

    # ---- lane-dense folded state precompute: (16,64) -> (8,128) ----
    #      fold: state s<8 -> sublane s, lanes 0:64 ; state s>=8 -> sublane s-8, lanes 64:128
    neg_a = slab_ref[_ROW_A:_ROW_A + HALF, :]                              # (8,128)
    dt2 = jnp.concatenate([dt, dt], axis=-1)                               # (L,128)
    dA_s[...] = jnp.exp(dt2[:, None, :] * neg_a[None, :, :])               # (L,8,128)
    dtx = dt * xc                                                          # (L,64)
    dBu_s[...] = jnp.concatenate(
        [bm[:, :HALF, None] * dtx[:, None, :],
         bm[:, HALF:, None] * dtx[:, None, :]], axis=-1)                   # (L,8,128)

    # ---- selective scan: 16-step unroll, h carried in one dense (8,128) vreg ----
    h = jnp.zeros((HALF, LANES), f32)
    for t in range(L):
        h = dA_s[t] * h + dBu_s[t]
        h_s[pl.ds(t * HALF, HALF), :] = h                                  # dense vreg store

    # ---- deferred C contraction: one bf16 block-diagonal MXU matmul (mask precomputed) ----
    cm2 = jnp.concatenate([cm[:, :HALF], cm[:, HALF:]], axis=0)            # (2L, 8)
    cmAB = jnp.tile(cm2, (1, L)) * slab_ref[_ROW_MASK:_ROW_MASK + 2 * L, :]  # (2L, 128)
    yab = lax.dot_general(cmAB.astype(bf16), h_s[...].astype(bf16), dn_s,
                          preferred_element_type=f32)                      # (2L, 128)
    y_scan = yab[:L, :DI] + yab[L:, DI:]                                   # (L, DI)

    # ---- D skip, SiLU gate, folded tail (w_lin @ w_out), residual, final bias ----
    d_row = slab_ref[_ROW_CONV + 2:_ROW_CONV + 3, 64:128]                  # D
    y = (y_scan + d_row * xc) * _silu(zv)                                  # (L, DI)
    w_comb = slab_ref[_ROW_WCOMB:_ROW_WCOMB + NUM_OUT, 0:64]               # (NUM_OUT, DI)
    out = lax.dot_general(y.astype(bf16), w_comb.astype(bf16), dn_t,
                          preferred_element_type=f32)                      # (L, NUM_OUT)
    o_ref[...] = out + res_lin + slab_ref[_ROW_CONV + 3:_ROW_CONV + 4, 64:64 + NUM_OUT]


def make_raw_params(key):
    """Raw, unfused parameters matching the PyTorch module layout."""
    ks = jax.random.split(key, 12)

    def rnd(k, shape, scale=0.1):
        return (scale * jax.random.normal(k, shape)).astype(jnp.float32)

    w_in_x = rnd(ks[0], (D_INNER, D_MODEL))          # in_proj rows, x branch
    w_in_z = rnd(ks[1], (D_INNER, D_MODEL))          # in_proj rows, z branch
    conv_w = rnd(ks[2], (D_CONV, D_INNER))           # depthwise conv (tap, channel)
    conv_b = rnd(ks[3], (1, D_INNER))
    w_dtx = rnd(ks[4], (DT_RANK, D_INNER))           # x_proj rows -> dt_rank
    w_b = rnd(ks[5], (D_STATE, D_INNER))             # x_proj rows -> B
    w_c = rnd(ks[6], (D_STATE, D_INNER))             # x_proj rows -> C
    w_dtp = rnd(ks[7], (D_INNER, DT_RANK), scale=0.5)
    b_dtp = rnd(ks[8], (1, D_INNER))
    a_logt = jnp.asarray(
        jnp.broadcast_to(
            jnp.log(jnp.arange(1, D_STATE + 1, dtype=jnp.float32))[:, None],
            (D_STATE, D_INNER)))                     # A_log^T  (d_state, d_inner)
    d_vec = jnp.ones((1, D_INNER), jnp.float32)      # D skip
    w_out = rnd(ks[9], (D_MODEL, D_INNER))           # out_proj (bias-free)
    w_lin = rnd(ks[10], (NUM_OUT, D_MODEL))          # final nn.Linear weight
    b_lin = rnd(ks[11], (1, NUM_OUT))                # final nn.Linear bias
    return (w_in_x, w_in_z, conv_w, conv_b, w_dtx, w_b, w_c, w_dtp, b_dtp,
            a_logt, d_vec, w_out, w_lin, b_lin)


def prepare_params(raw):
    """One-time parameter fusion / packing (kept OFF the per-call forward path)."""
    (w_in_x, w_in_z, conv_w, conv_b, w_dtx, w_b, w_c, w_dtp, b_dtp,
     a_logt, d_vec, w_out, w_lin, b_lin) = raw
    f32 = jnp.float32

    # in_proj extended with the final Linear rows (residual fold), bf16 for the MXU
    w_in_ext = jnp.concatenate([w_in_x, w_in_z, w_lin], axis=0).astype(jnp.bfloat16)
    # x_proj + dt_proj low-rank fold, bf16
    w_dt_full = w_dtp @ w_dtx
    w_xproj = jnp.concatenate([w_dt_full, w_b, w_c], axis=0).astype(jnp.bfloat16)
    # A = -exp(A_log), folded (16,64) -> (8,128): states 0:8 in lanes 0:64, 8:16 in 64:128
    neg_a = -jnp.exp(a_logt)
    neg_a_fold = jnp.concatenate([neg_a[:HALF], neg_a[HALF:]], axis=1)
    # tail fold
    w_comb = w_lin @ w_out                                          # (NUM_OUT, D_INNER)
    # block-diagonal mask for the deferred C contraction (shape-only constant)
    t_idx = jnp.arange(SEQ_LEN, dtype=jnp.int32)[:, None]
    c_idx = jnp.arange(SEQ_LEN * HALF, dtype=jnp.int32)[None, :]
    blk = (c_idx // HALF == t_idx).astype(f32)                      # (L, L*HALF) = (16,128)
    mask_ab = jnp.concatenate([blk, blk], axis=0)                   # (32,128)

    slab = jnp.zeros((SLAB_ROWS, LANES), f32)
    slab = slab.at[_ROW_A:_ROW_A + HALF, :].set(neg_a_fold)
    slab = slab.at[_ROW_MASK:_ROW_MASK + 2 * SEQ_LEN, :].set(mask_ab)
    slab = slab.at[_ROW_WCOMB:_ROW_WCOMB + NUM_OUT, 0:64].set(w_comb)
    slab = slab.at[_ROW_CONV:_ROW_CONV + D_CONV, 0:64].set(conv_w)
    slab = slab.at[_ROW_CONV:_ROW_CONV + 1, 64:128].set(conv_b)
    slab = slab.at[_ROW_CONV + 1:_ROW_CONV + 2, 64:128].set(b_dtp)
    slab = slab.at[_ROW_CONV + 2:_ROW_CONV + 3, 64:128].set(d_vec)
    slab = slab.at[_ROW_CONV + 3:_ROW_CONV + 4, 64:64 + NUM_OUT].set(b_lin)
    return w_in_ext, w_xproj, slab


@jax.jit
def mamba_forward(x, w_in_ext, w_xproj, slab):
    """x: (B, SEQ_LEN, D_MODEL) batch of independent sequences -> (B, SEQ_LEN, NUM_OUT)."""
    batch = x.shape[0]
    return pl.pallas_call(
        mamba_kernel,
        out_shape=jax.ShapeDtypeStruct((batch, SEQ_LEN, NUM_OUT), jnp.float32),
        grid=(batch,),
        in_specs=[
            pl.BlockSpec((None, SEQ_LEN, D_MODEL), lambda b: (b, 0, 0)),
            pl.BlockSpec(w_in_ext.shape, lambda b: (0, 0)),
            pl.BlockSpec(w_xproj.shape, lambda b: (0, 0)),
            pl.BlockSpec(slab.shape, lambda b: (0, 0)),
        ],
        out_specs=pl.BlockSpec((None, SEQ_LEN, NUM_OUT), lambda b: (b, 0, 0)),
        scratch_shapes=[
            pltpu.VMEM((SEQ_LEN, HALF, LANES), jnp.float32),   # exp(dt*A), folded
            pltpu.VMEM((SEQ_LEN, HALF, LANES), jnp.float32),   # B (x) (dt*x), folded
            pltpu.VMEM((SEQ_LEN * HALF, LANES), jnp.float32),  # stacked folded h_t
        ],
        compiler_params=pltpu.CompilerParams(
            dimension_semantics=("parallel",)),                # shards batch across TCs on v7x
    )(x, w_in_ext, w_xproj, slab)


def mamba_ref(x, raw):
    """Pure-JAX f32 reference for a single (SEQ_LEN, D_MODEL) sequence."""
    (w_in_x, w_in_z, conv_w, conv_b, w_dtx, w_b, w_c, w_dtp, b_dtp,
     a_logt, d_vec, w_out, w_lin, b_lin) = raw
    xin = x @ w_in_x.T
    z = x @ w_in_z.T
    pad = jnp.concatenate([jnp.zeros((D_CONV - 1, D_INNER), jnp.float32), xin], axis=0)
    acc = jnp.zeros_like(xin) + conv_b
    for k in range(D_CONV):
        acc = acc + pad[k:k + SEQ_LEN] * conv_w[k:k + 1]
    xc = acc * jax.nn.sigmoid(acc)
    dt = jax.nn.softplus((xc @ w_dtx.T) @ w_dtp.T + b_dtp)
    bm = xc @ w_b.T
    cm = xc @ w_c.T
    a_t = -jnp.exp(a_logt)

    def step(h, inp):
        dt_t, x_t, b_t, c_t = inp
        dA = jnp.exp(dt_t[None, :] * a_t)
        dBu = b_t[:, None] * (dt_t * x_t)[None, :]
        h = dA * h + dBu
        y = jnp.sum(c_t[:, None] * h, axis=0) + d_vec[0] * x_t
        return h, y

    _, ys = lax.scan(step, jnp.zeros((D_STATE, D_INNER), jnp.float32), (dt, xc, bm, cm))
    y = ys * (z * jax.nn.sigmoid(z))
    out = y @ w_out.T + x
    return out @ w_lin.T + b_lin


if __name__ == "__main__":
    key = jax.random.PRNGKey(0)
    kx, kp = jax.random.split(key)
    BATCH = 4  # batch of independent sequences; each one reproduces the module's forward
    x = jax.random.normal(kx, (BATCH, SEQ_LEN, D_MODEL)).astype(jnp.float32)
    raw = make_raw_params(kp)

    # one-time parameter fusion (off the per-call path)
    fused = prepare_params(raw)
    fused = tuple(jax.block_until_ready(a) for a in fused)

    out = mamba_forward(x, *fused)
    jax.block_until_ready(out)

    ref = jnp.stack([mamba_ref(x[b], raw) for b in range(BATCH)], axis=0)
    assert out.shape == (BATCH, SEQ_LEN, NUM_OUT)
    err = float(jnp.max(jnp.abs(out - ref)))
    assert jnp.allclose(out, ref, atol=3e-2, rtol=3e-2), err
    print("KERNEL_OK")
</pallas_src>

<mosaic_0001>
module attributes {stable_mosaic.version = 11 : i64} {
  func.func @mamba_kernel(%arg0: i32, %arg1: memref<1x16x32xf32, #tpu.memory_space<vmem>>, %arg2: memref<136x32xbf16, #tpu.memory_space<vmem>>, %arg3: memref<96x64xbf16, #tpu.memory_space<vmem>>, %arg4: memref<56x128xf32, #tpu.memory_space<vmem>>, %arg5: memref<1x16x8xf32, #tpu.memory_space<vmem>>, %arg6: memref<16x8x128xf32, #tpu.memory_space<vmem>>, %arg7: memref<16x8x128xf32, #tpu.memory_space<vmem>>, %arg8: memref<128x128xf32, #tpu.memory_space<vmem>>) attributes {dimension_semantics = [#tpu.dimension_semantics<parallel>], iteration_bounds = array<i64: 4>, scalar_prefetch = 0 : i64, scratch_operands = 3 : i64, tpu.core_type = #tpu.core_type<tc>, window_params = [{transform_indices = @transform_0, window_bounds = array<i64: 1, 16, 32>}, {pipeline_mode = #tpu.pipeline_mode<synchronous>, transform_indices = @transform_1, window_bounds = array<i64: 136, 32>}, {pipeline_mode = #tpu.pipeline_mode<synchronous>, transform_indices = @transform_2, window_bounds = array<i64: 96, 64>}, {pipeline_mode = #tpu.pipeline_mode<synchronous>, transform_indices = @transform_3, window_bounds = array<i64: 56, 128>}, {transform_indices = @transform_4, window_bounds = array<i64: 1, 16, 8>}]} {
    %c0 = arith.constant 0 : index
    %c0_0 = arith.constant 0 : index
    %c0_1 = arith.constant 0 : index
    %0 = vector.load %arg1[%c0, %c0_0, %c0_1] : memref<1x16x32xf32, #tpu.memory_space<vmem>>, vector<1x16x32xf32>
    %1 = vector.shape_cast %0 : vector<1x16x32xf32> to vector<16x32xf32>
    %2 = arith.truncf %1 : vector<16x32xf32> to vector<16x32xbf16>
    %c0_2 = arith.constant 0 : index
    %c0_3 = arith.constant 0 : index
    %3 = vector.load %arg2[%c0_2, %c0_3] : memref<136x32xbf16, #tpu.memory_space<vmem>>, vector<136x32xbf16>
    %cst = arith.constant dense<0.000000e+00> : vector<16x136xf32>
    %4 = tpu.matmul %2, %3, %cst {dimension_numbers = #tpu.dot_dimension_numbers<[1], [1], [0], [0], [0, 0, 1, 0], [], []>} : vector<16x32xbf16>, vector<136x32xbf16>, vector<16x136xf32> -> vector<16x136xf32>
    %5 = vector.extract_strided_slice %4 {offsets = [0, 0], sizes = [16, 64], strides = [1, 1]} : vector<16x136xf32> to vector<16x64xf32>
    %6 = vector.extract_strided_slice %4 {offsets = [0, 64], sizes = [16, 64], strides = [1, 1]} : vector<16x136xf32> to vector<16x64xf32>
    %7 = vector.extract_strided_slice %4 {offsets = [0, 128], sizes = [16, 8], strides = [1, 1]} : vector<16x136xf32> to vector<16x8xf32>
    %8 = tpu.iota {dimensions = array<i32: 0>} : vector<16x64xi32>
    %cst_4 = arith.constant 0.000000e+00 : f32
    %9 = vector.broadcast %cst_4 : f32 to vector<16x64xf32>
    %c48 = arith.constant 48 : index
    %c64 = arith.constant 64 : index
    %10 = vector.load %arg4[%c48, %c64] : memref<56x128xf32, #tpu.memory_space<vmem>>, vector<1x64xf32>
    %11 = vector.broadcast %10 : vector<1x64xf32> to vector<16x64xf32>
    %12 = arith.addf %9, %11 : vector<16x64xf32>
    %c3_i32 = arith.constant 3 : i32
    %13 = tpu.dynamic_rotate %5 by %c3_i32 dim 0 : vector<16x64xf32>, i32 -> vector<16x64xf32>
    %c3_i32_5 = arith.constant 3 : i32
    %14 = vector.broadcast %c3_i32_5 : i32 to vector<16x64xi32>
    %15 = arith.cmpi sge, %8, %14 : vector<16x64xi32>
    %cst_6 = arith.constant 0.000000e+00 : f32
    %16 = vector.broadcast %cst_6 : f32 to vector<16x64xf32>
    %17 = arith.select %15, %13, %16 : vector<16x64xi1>, vector<16x64xf32>
    %c48_7 = arith.constant 48 : index
    %c0_8 = arith.constant 0 : index
    %18 = vector.load %arg4[%c48_7, %c0_8] : memref<56x128xf32, #tpu.memory_space<vmem>>, vector<1x64xf32>
    %19 = vector.broadcast %18 : vector<1x64xf32> to vector<16x64xf32>
    %20 = arith.mulf %17, %19 : vector<16x64xf32>
    %21 = arith.addf %12, %20 : vector<16x64xf32>
    %c2_i32 = arith.constant 2 : i32
    %22 = tpu.dynamic_rotate %5 by %c2_i32 dim 0 : vector<16x64xf32>, i32 -> vector<16x64xf32>
    %c2_i32_9 = arith.constant 2 : i32
    %23 = vector.broadcast %c2_i32_9 : i32 to vector<16x64xi32>
    %24 = arith.cmpi sge, %8, %23 : vector<16x64xi32>
    %cst_10 = arith.constant 0.000000e+00 : f32
    %25 = vector.broadcast %cst_10 : f32 to vector<16x64xf32>
    %26 = arith.select %24, %22, %25 : vector<16x64xi1>, vector<16x64xf32>
    %c49 = arith.constant 49 : index
    %c0_11 = arith.constant 0 : index
    %27 = vector.load %arg4[%c49, %c0_11] : memref<56x128xf32, #tpu.memory_space<vmem>>, vector<1x64xf32>
    %28 = vector.broadcast %27 : vector<1x64xf32> to vector<16x64xf32>
    %29 = arith.mulf %26, %28 : vector<16x64xf32>
    %30 = arith.addf %21, %29 : vector<16x64xf32>
    %c1_i32 = arith.constant 1 : i32
    %31 = tpu.dynamic_rotate %5 by %c1_i32 dim 0 : vector<16x64xf32>, i32 -> vector<16x64xf32>
    %c1_i32_12 = arith.constant 1 : i32
    %32 = vector.broadcast %c1_i32_12 : i32 to vector<16x64xi32>
    %33 = arith.cmpi sge, %8, %32 : vector<16x64xi32>
    %cst_13 = arith.constant 0.000000e+00 : f32
    %34 = vector.broadcast %cst_13 : f32 to vector<16x64xf32>
    %35 = arith.select %33, %31, %34 : vector<16x64xi1>, vector<16x64xf32>
    %c50 = arith.constant 50 : index
    %c0_14 = arith.constant 0 : index
    %36 = vector.load %arg4[%c50, %c0_14] : memref<56x128xf32, #tpu.memory_space<vmem>>, vector<1x64xf32>
    %37 = vector.broadcast %36 : vector<1x64xf32> to vector<16x64xf32>
    %38 = arith.mulf %35, %37 : vector<16x64xf32>
    %39 = arith.addf %30, %38 : vector<16x64xf32>
    %c51 = arith.constant 51 : index
    %c0_15 = arith.constant 0 : index
    %40 = vector.load %arg4[%c51, %c0_15] : memref<56x128xf32, #tpu.memory_space<vmem>>, vector<1x64xf32>
    %41 = vector.broadcast %40 : vector<1x64xf32> to vector<16x64xf32>
    %42 = arith.mulf %5, %41 : vector<16x64xf32>
    %43 = arith.addf %39, %42 : vector<16x64xf32>
    %cst_16 = arith.constant 0.000000e+00 : f32
    %44 = vector.broadcast %cst_16 : f32 to vector<16x64xf32>
    %45 = arith.subf %44, %43 : vector<16x64xf32>
    %46 = math.exp %45 : vector<16x64xf32>
    %cst_17 = arith.constant 1.000000e+00 : f32
    %47 = vector.broadcast %cst_17 : f32 to vector<16x64xf32>
    %48 = arith.addf %47, %46 : vector<16x64xf32>
    %49 = tpu.reciprocal %48 {approx = true} : vector<16x64xf32> -> vector<16x64xf32>
    %50 = arith.mulf %43, %49 : vector<16x64xf32>
    %51 = arith.truncf %50 : vector<16x64xf32> to vector<16x64xbf16>
    %c0_18 = arith.constant 0 : index
    %c0_19 = arith.constant 0 : index
    %52 = vector.load %arg3[%c0_18, %c0_19] : memref<96x64xbf16, #tpu.memory_space<vmem>>, vector<96x64xbf16>
    %cst_20 = arith.constant dense<0.000000e+00> : vector<16x96xf32>
    %53 = tpu.matmul %51, %52, %cst_20 {dimension_numbers = #tpu.dot_dimension_numbers<[1], [1], [0], [0], [0, 0, 1, 0], [], []>} : vector<16x64xbf16>, vector<96x64xbf16>, vector<16x96xf32> -> vector<16x96xf32>
    %54 = vector.extract_strided_slice %53 {offsets = [0, 0], sizes = [16, 64], strides = [1, 1]} : vector<16x96xf32> to vector<16x64xf32>
    %c49_21 = arith.constant 49 : index
    %c64_22 = arith.constant 64 : index
    %55 = vector.load %arg4[%c49_21, %c64_22] : memref<56x128xf32, #tpu.memory_space<vmem>>, vector<1x64xf32>
    %56 = vector.broadcast %55 : vector<1x64xf32> to vector<16x64xf32>
    %57 = arith.addf %54, %56 : vector<16x64xf32>
    %cst_23 = arith.constant 2.000000e+01 : f32
    %58 = vector.broadcast %cst_23 : f32 to vector<16x64xf32>
    %59 = arith.cmpf ogt, %57, %58 : vector<16x64xf32>
    %cst_24 = arith.constant 2.000000e+01 : f32
    %60 = vector.broadcast %cst_24 : f32 to vector<16x64xf32>
    %61 = arith.minimumf %57, %60 : vector<16x64xf32>
    %62 = math.exp %61 : vector<16x64xf32>
    %63 = math.log1p %62 : vector<16x64xf32>
    %64 = arith.select %59, %57, %63 : vector<16x64xi1>, vector<16x64xf32>
    %65 = vector.extract_strided_slice %53 {offsets = [0, 64], sizes = [16, 16], strides = [1, 1]} : vector<16x96xf32> to vector<16x16xf32>
    %66 = vector.extract_strided_slice %53 {offsets = [0, 80], sizes = [16, 16], strides = [1, 1]} : vector<16x96xf32> to vector<16x16xf32>
    %c0_25 = arith.constant 0 : index
    %c0_26 = arith.constant 0 : index
    %67 = vector.load %arg4[%c0_25, %c0_26] : memref<56x128xf32, #tpu.memory_space<vmem>>, vector<8x128xf32>
    %68 = tpu.concatenate %64, %64 in 1 : vector<16x64xf32>, vector<16x64xf32> -> vector<16x128xf32>
    %69 = vector.shape_cast %68 : vector<16x128xf32> to vector<16x1x128xf32>
    %70 = vector.shape_cast %67 : vector<8x128xf32> to vector<1x8x128xf32>
    %71 = vector.broadcast %69 : vector<16x1x128xf32> to vector<16x8x128xf32>
    %72 = vector.broadcast %70 : vector<1x8x128xf32> to vector<16x8x128xf32>
    %73 = arith.mulf %71, %72 : vector<16x8x128xf32>
    %74 = math.exp %73 : vector<16x8x128xf32>
    %c0_27 = arith.constant 0 : index
    %c0_28 = arith.constant 0 : index
    %c0_29 = arith.constant 0 : index
    %75 = vector.load %arg6[%c0_27, %c0_28, %c0_29] : memref<16x8x128xf32, #tpu.memory_space<vmem>>, vector<16x8x128xf32>
    tpu.vector_store %arg6[%c0_27, %c0_28, %c0_29], %74 {strides = array<i32>} : memref<16x8x128xf32, #tpu.memory_space<vmem>>, vector<16x8x128xf32>,
    %76 = arith.mulf %64, %50 : vector<16x64xf32>
    %77 = vector.extract_strided_slice %65 {offsets = [0, 0], sizes = [16, 8], strides = [1, 1]} : vector<16x16xf32> to vector<16x8xf32>
    %78 = vector.shape_cast %77 : vector<16x8xf32> to vector<16x8x1xf32>
    %79 = vector.shape_cast %76 : vector<16x64xf32> to vector<16x1x64xf32>
    %80 = vector.broadcast %78 : vector<16x8x1xf32> to vector<16x8x64xf32>
    %81 = vector.broadcast %79 : vector<16x1x64xf32> to vector<16x8x64xf32>
    %82 = arith.mulf %80, %81 : vector<16x8x64xf32>
    %83 = vector.extract_strided_slice %65 {offsets = [0, 8], sizes = [16, 8], strides = [1, 1]} : vector<16x16xf32> to vector<16x8xf32>
    %84 = vector.shape_cast %83 : vector<16x8xf32> to vector<16x8x1xf32>
    %85 = vector.shape_cast %76 : vector<16x64xf32> to vector<16x1x64xf32>
    %86 = vector.broadcast %84 : vector<16x8x1xf32> to vector<16x8x64xf32>
    %87 = vector.broadcast %85 : vector<16x1x64xf32> to vector<16x8x64xf32>
    %88 = arith.mulf %86, %87 : vector<16x8x64xf32>
    %89 = tpu.concatenate %82, %88 in 2 : vector<16x8x64xf32>, vector<16x8x64xf32> -> vector<16x8x128xf32>
    %c0_30 = arith.constant 0 : index
    %c0_31 = arith.constant 0 : index
    %c0_32 = arith.constant 0 : index
    %90 = vector.load %arg7[%c0_30, %c0_31, %c0_32] : memref<16x8x128xf32, #tpu.memory_space<vmem>>, vector<16x8x128xf32>
    tpu.vector_store %arg7[%c0_30, %c0_31, %c0_32], %89 {strides = array<i32>} : memref<16x8x128xf32, #tpu.memory_space<vmem>>, vector<16x8x128xf32>,
    %cst_33 = arith.constant 0.000000e+00 : f32
    %91 = vector.broadcast %cst_33 : f32 to vector<8x128xf32>
    %c0_34 = arith.constant 0 : index
    %c0_35 = arith.constant 0 : index
    %c0_36 = arith.constant 0 : index
    %92 = vector.load %arg6[%c0_34, %c0_35, %c0_36] : memref<16x8x128xf32, #tpu.memory_space<vmem>>, vector<1x8x128xf32>
    %93 = vector.shape_cast %92 : vector<1x8x128xf32> to vector<8x128xf32>
    %94 = arith.mulf %93, %91 : vector<8x128xf32>
    %c0_37 = arith.constant 0 : index
    %c0_38 = arith.constant 0 : index
    %c0_39 = arith.constant 0 : index
    %95 = vector.load %arg7[%c0_37, %c0_38, %c0_39] : memref<16x8x128xf32, #tpu.memory_space<vmem>>, vector<1x8x128xf32>
    %96 = vector.shape_cast %95 : vector<1x8x128xf32> to vector<8x128xf32>
    %97 = arith.addf %94, %96 : vector<8x128xf32>
    %c0_40 = arith.constant 0 : index
    %c0_41 = arith.constant 0 : index
    %98 = vector.load %arg8[%c0_40, %c0_41] : memref<128x128xf32, #tpu.memory_space<vmem>>, vector<8x128xf32>
    tpu.vector_store %arg8[%c0_40, %c0_41], %97 {strides = array<i32>} : memref<128x128xf32, #tpu.memory_space<vmem>>, vector<8x128xf32>,
    %c1 = arith.constant 1 : index
    %c0_42 = arith.constant 0 : index
    %c0_43 = arith.constant 0 : index
    %99 = vector.load %arg6[%c1, %c0_42, %c0_43] : memref<16x8x128xf32, #tpu.memory_space<vmem>>, vector<1x8x128xf32>
    %100 = vector.shape_cast %99 : vector<1x8x128xf32> to vector<8x128xf32>
    %101 = arith.mulf %100, %97 : vector<8x128xf32>
    %c1_44 = arith.constant 1 : index
    %c0_45 = arith.constant 0 : index
    %c0_46 = arith.constant 0 : index
    %102 = vector.load %arg7[%c1_44, %c0_45, %c0_46] : memref<16x8x128xf32, #tpu.memory_space<vmem>>, vector<1x8x128xf32>
    %103 = vector.shape_cast %102 : vector<1x8x128xf32> to vector<8x128xf32>
    %104 = arith.addf %101, %103 : vector<8x128xf32>
    %c8 = arith.constant 8 : index
    %c0_47 = arith.constant 0 : index
    %105 = vector.load %arg8[%c8, %c0_47] : memref<128x128xf32, #tpu.memory_space<vmem>>, vector<8x128xf32>
    tpu.vector_store %arg8[%c8, %c0_47], %104 {strides = array<i32>} : memref<128x128xf32, #tpu.memory_space<vmem>>, vector<8x128xf32>,
    %c2 = arith.constant 2 : index
    %c0_48 = arith.constant 0 : index
    %c0_49 = arith.constant 0 : index
    %106 = vector.load %arg6[%c2, %c0_48, %c0_49] : memref<16x8x128xf32, #tpu.memory_space<vmem>>, vector<1x8x128xf32>
    %107 = vector.shape_cast %106 : vector<1x8x128xf32> to vector<8x128xf32>
    %108 = arith.mulf %107, %104 : vector<8x128xf32>
    %c2_50 = arith.constant 2 : index
    %c0_51 = arith.constant 0 : index
    %c0_52 = arith.constant 0 : index
    %109 = vector.load %arg7[%c2_50, %c0_51, %c0_52] : memref<16x8x128xf32, #tpu.memory_space<vmem>>, vector<1x8x128xf32>
    %110 = vector.shape_cast %109 : vector<1x8x128xf32> to vector<8x128xf32>
    %111 = arith.addf %108, %110 : vector<8x128xf32>
    %c16 = arith.constant 16 : index
    %c0_53 = arith.constant 0 : index
    %112 = vector.load %arg8[%c16, %c0_53] : memref<128x128xf32, #tpu.memory_space<vmem>>, vector<8x128xf32>
    tpu.vector_store %arg8[%c16, %c0_53], %111 {strides = array<i32>} : memref<128x128xf32, #tpu.memory_space<vmem>>, vector<8x128xf32>,
    %c3 = arith.constant 3 : index
    %c0_54 = arith.constant 0 : index
    %c0_55 = arith.constant 0 : index
    %113 = vector.load %arg6[%c3, %c0_54, %c0_55] : memref<16x8x128xf32, #tpu.memory_space<vmem>>, vector<1x8x128xf32>
    %114 = vector.shape_cast %113 : vector<1x8x128xf32> to vector<8x128xf32>
    %115 = arith.mulf %114, %111 : vector<8x128xf32>
    %c3_56 = arith.constant 3 : index
    %c0_57 = arith.constant 0 : index
    %c0_58 = arith.constant 0 : index
    %116 = vector.load %arg7[%c3_56, %c0_57, %c0_58] : memref<16x8x128xf32, #tpu.memory_space<vmem>>, vector<1x8x128xf32>
    %117 = vector.shape_cast %116 : vector<1x8x128xf32> to vector<8x128xf32>
    %118 = arith.addf %115, %117 : vector<8x128xf32>
    %c24 = arith.constant 24 : index
    %c0_59 = arith.constant 0 : index
    %119 = vector.load %arg8[%c24, %c0_59] : memref<128x128xf32, #tpu.memory_space<vmem>>, vector<8x128xf32>
    tpu.vector_store %arg8[%c24, %c0_59], %118 {strides = array<i32>} : memref<128x128xf32, #tpu.memory_space<vmem>>, vector<8x128xf32>,
    %c4 = arith.constant 4 : index
    %c0_60 = arith.constant 0 : index
    %c0_61 = arith.constant 0 : index
    %120 = vector.load %arg6[%c4, %c0_60, %c0_61] : memref<16x8x128xf32, #tpu.memory_space<vmem>>, vector<1x8x128xf32>
    %121 = vector.shape_cast %120 : vector<1x8x128xf32> to vector<8x128xf32>
    %122 = arith.mulf %121, %118 : vector<8x128xf32>
    %c4_62 = arith.constant 4 : index
    %c0_63 = arith.constant 0 : index
    %c0_64 = arith.constant 0 : index
    %123 = vector.load %arg7[%c4_62, %c0_63, %c0_64] : memref<16x8x128xf32, #tpu.memory_space<vmem>>, vector<1x8x128xf32>
    %124 = vector.shape_cast %123 : vector<1x8x128xf32> to vector<8x128xf32>
    %125 = arith.addf %122, %124 : vector<8x128xf32>
    %c32 = arith.constant 32 : index
    %c0_65 = arith.constant 0 : index
    %126 = vector.load %arg8[%c32, %c0_65] : memref<128x128xf32, #tpu.memory_space<vmem>>, vector<8x128xf32>
    tpu.vector_store %arg8[%c32, %c0_65], %125 {strides = array<i32>} : memref<128x128xf32, #tpu.memory_space<vmem>>, vector<8x128xf32>,
    %c5 = arith.constant 5 : index
    %c0_66 = arith.constant 0 : index
    %c0_67 = arith.constant 0 : index
    %127 = vector.load %arg6[%c5, %c0_66, %c0_67] : memref<16x8x128xf32, #tpu.memory_space<vmem>>, vector<1x8x128xf32>
    %128 = vector.shape_cast %127 : vector<1x8x128xf32> to vector<8x128xf32>
    %129 = arith.mulf %128, %125 : vector<8x128xf32>
    %c5_68 = arith.constant 5 : index
    %c0_69 = arith.constant 0 : index
    %c0_70 = arith.constant 0 : index
    %130 = vector.load %arg7[%c5_68, %c0_69, %c0_70] : memref<16x8x128xf32, #tpu.memory_space<vmem>>, vector<1x8x128xf32>
    %131 = vector.shape_cast %130 : vector<1x8x128xf32> to vector<8x128xf32>
    %132 = arith.addf %129, %131 : vector<8x128xf32>
    %c40 = arith.constant 40 : index
    %c0_71 = arith.constant 0 : index
    %133 = vector.load %arg8[%c40, %c0_71] : memref<128x128xf32, #tpu.memory_space<vmem>>, vector<8x128xf32>
    tpu.vector_store %arg8[%c40, %c0_71], %132 {strides = array<i32>} : memref<128x128xf32, #tpu.memory_space<vmem>>, vector<8x128xf32>,
    %c6 = arith.constant 6 : index
    %c0_72 = arith.constant 0 : index
    %c0_73 = arith.constant 0 : index
    %134 = vector.load %arg6[%c6, %c0_72, %c0_73] : memref<16x8x128xf32, #tpu.memory_space<vmem>>, vector<1x8x128xf32>
    %135 = vector.shape_cast %134 : vector<1x8x128xf32> to vector<8x128xf32>
    %136 = arith.mulf %135, %132 : vector<8x128xf32>
    %c6_74 = arith.constant 6 : index
    %c0_75 = arith.constant 0 : index
    %c0_76 = arith.constant 0 : index
    %137 = vector.load %arg7[%c6_74, %c0_75, %c0_76] : memref<16x8x128xf32, #tpu.memory_space<vmem>>, vector<1x8x128xf32>
    %138 = vector.shape_cast %137 : vector<1x8x128xf32> to vector<8x128xf32>
    %139 = arith.addf %136, %138 : vector<8x128xf32>
    %c48_77 = arith.constant 48 : index
    %c0_78 = arith.constant 0 : index
    %140 = vector.load %arg8[%c48_77, %c0_78] : memref<128x128xf32, #tpu.memory_space<vmem>>, vector<8x128xf32>
    tpu.vector_store %arg8[%c48_77, %c0_78], %139 {strides = array<i32>} : memref<128x128xf32, #tpu.memory_space<vmem>>, vector<8x128xf32>,
    %c7 = arith.constant 7 : index
    %c0_79 = arith.constant 0 : index
    %c0_80 = arith.constant 0 : index
    %141 = vector.load %arg6[%c7, %c0_79, %c0_80] : memref<16x8x128xf32, #tpu.memory_space<vmem>>, vector<1x8x128xf32>
    %142 = vector.shape_cast %141 : vector<1x8x128xf32> to vector<8x128xf32>
    %143 = arith.mulf %142, %139 : vector<8x128xf32>
    %c7_81 = arith.constant 7 : index
    %c0_82 = arith.constant 0 : index
    %c0_83 = arith.constant 0 : index
    %144 = vector.load %arg7[%c7_81, %c0_82, %c0_83] : memref<16x8x128xf32, #tpu.memory_space<vmem>>, vector<1x8x128xf32>
    %145 = vector.shape_cast %144 : vector<1x8x128xf32> to vector<8x128xf32>
    %146 = arith.addf %143, %145 : vector<8x128xf32>
    %c56 = arith.constant 56 : index
    %c0_84 = arith.constant 0 : index
    %147 = vector.load %arg8[%c56, %c0_84] : memref<128x128xf32, #tpu.memory_space<vmem>>, vector<8x128xf32>
    tpu.vector_store %arg8[%c56, %c0_84], %146 {strides = array<i32>} : memref<128x128xf32, #tpu.memory_space<vmem>>, vector<8x128xf32>,
    %c8_85 = arith.constant 8 : index
    %c0_86 = arith.constant 0 : index
    %c0_87 = arith.constant 0 : index
    %148 = vector.load %arg6[%c8_85, %c0_86, %c0_87] : memref<16x8x128xf32, #tpu.memory_space<vmem>>, vector<1x8x128xf32>
    %149 = vector.shape_cast %148 : vector<1x8x128xf32> to vector<8x128xf32>
    %150 = arith.mulf %149, %146 : vector<8x128xf32>
    %c8_88 = arith.constant 8 : index
    %c0_89 = arith.constant 0 : index
    %c0_90 = arith.constant 0 : index
    %151 = vector.load %arg7[%c8_88, %c0_89, %c0_90] : memref<16x8x128xf32, #tpu.memory_space<vmem>>, vector<1x8x128xf32>
    %152 = vector.shape_cast %151 : vector<1x8x128xf32> to vector<8x128xf32>
    %153 = arith.addf %150, %152 : vector<8x128xf32>
    %c64_91 = arith.constant 64 : index
    %c0_92 = arith.constant 0 : index
    %154 = vector.load %arg8[%c64_91, %c0_92] : memref<128x128xf32, #tpu.memory_space<vmem>>, vector<8x128xf32>
    tpu.vector_store %arg8[%c64_91, %c0_92], %153 {strides = array<i32>} : memref<128x128xf32, #tpu.memory_space<vmem>>, vector<8x128xf32>,
    %c9 = arith.constant 9 : index
    %c0_93 = arith.constant 0 : index
    %c0_94 = arith.constant 0 : index
    %155 = vector.load %arg6[%c9, %c0_93, %c0_94] : memref<16x8x128xf32, #tpu.memory_space<vmem>>, vector<1x8x128xf32>
    %156 = vector.shape_cast %155 : vector<1x8x128xf32> to vector<8x128xf32>
    %157 = arith.mulf %156, %153 : vector<8x128xf32>
    %c9_95 = arith.constant 9 : index
    %c0_96 = arith.constant 0 : index
    %c0_97 = arith.constant 0 : index
    %158 = vector.load %arg7[%c9_95, %c0_96, %c0_97] : memref<16x8x128xf32, #tpu.memory_space<vmem>>, vector<1x8x128xf32>
    %159 = vector.shape_cast %158 : vector<1x8x128xf32> to vector<8x128xf32>
    %160 = arith.addf %157, %159 : vector<8x128xf32>
    %c72 = arith.constant 72 : index
    %c0_98 = arith.constant 0 : index
    %161 = vector.load %arg8[%c72, %c0_98] : memref<128x128xf32, #tpu.memory_space<vmem>>, vector<8x128xf32>
    tpu.vector_store %arg8[%c72, %c0_98], %160 {strides = array<i32>} : memref<128x128xf32, #tpu.memory_space<vmem>>, vector<8x128xf32>,
    %c10 = arith.constant 10 : index
    %c0_99 = arith.constant 0 : index
    %c0_100 = arith.constant 0 : index
    %162 = vector.load %arg6[%c10, %c0_99, %c0_100] : memref<16x8x128xf32, #tpu.memory_space<vmem>>, vector<1x8x128xf32>
    %163 = vector.shape_cast %162 : vector<1x8x128xf32> to vector<8x128xf32>
    %164 = arith.mulf %163, %160 : vector<8x128xf32>
    %c10_101 = arith.constant 10 : index
    %c0_102 = arith.constant 0 : index
    %c0_103 = arith.constant 0 : index
    %165 = vector.load %arg7[%c10_101, %c0_102, %c0_103] : memref<16x8x128xf32, #tpu.memory_space<vmem>>, vector<1x8x128xf32>
    %166 = vector.shape_cast %165 : vector<1x8x128xf32> to vector<8x128xf32>
    %167 = arith.addf %164, %166 : vector<8x128xf32>
    %c80 = arith.constant 80 : index
    %c0_104 = arith.constant 0 : index
    %168 = vector.load %arg8[%c80, %c0_104] : memref<128x128xf32, #tpu.memory_space<vmem>>, vector<8x128xf32>
    tpu.vector_store %arg8[%c80, %c0_104], %167 {strides = array<i32>} : memref<128x128xf32, #tpu.memory_space<vmem>>, vector<8x128xf32>,
    %c11 = arith.constant 11 : index
    %c0_105 = arith.constant 0 : index
    %c0_106 = arith.constant 0 : index
    %169 = vector.load %arg6[%c11, %c0_105, %c0_106] : memref<16x8x128xf32, #tpu.memory_space<vmem>>, vector<1x8x128xf32>
    %170 = vector.shape_cast %169 : vector<1x8x128xf32> to vector<8x128xf32>
    %171 = arith.mulf %170, %167 : vector<8x128xf32>
    %c11_107 = arith.constant 11 : index
    %c0_108 = arith.constant 0 : index
    %c0_109 = arith.constant 0 : index
    %172 = vector.load %arg7[%c11_107, %c0_108, %c0_109] : memref<16x8x128xf32, #tpu.memory_space<vmem>>, vector<1x8x128xf32>
    %173 = vector.shape_cast %172 : vector<1x8x128xf32> to vector<8x128xf32>
    %174 = arith.addf %171, %173 : vector<8x128xf32>
    %c88 = arith.constant 88 : index
    %c0_110 = arith.constant 0 : index
    %175 = vector.load %arg8[%c88, %c0_110] : memref<128x128xf32, #tpu.memory_space<vmem>>, vector<8x128xf32>
    tpu.vector_store %arg8[%c88, %c0_110], %174 {strides = array<i32>} : memref<128x128xf32, #tpu.memory_space<vmem>>, vector<8x128xf32>,
    %c12 = arith.constant 12 : index
    %c0_111 = arith.constant 0 : index
    %c0_112 = arith.constant 0 : index
    %176 = vector.load %arg6[%c12, %c0_111, %c0_112] : memref<16x8x128xf32, #tpu.memory_space<vmem>>, vector<1x8x128xf32>
    %177 = vector.shape_cast %176 : vector<1x8x128xf32> to vector<8x128xf32>
    %178 = arith.mulf %177, %174 : vector<8x128xf32>
    %c12_113 = arith.constant 12 : index
    %c0_114 = arith.constant 0 : index
    %c0_115 = arith.constant 0 : index
    %179 = vector.load %arg7[%c12_113, %c0_114, %c0_115] : memref<16x8x128xf32, #tpu.memory_space<vmem>>, vector<1x8x128xf32>
    %180 = vector.shape_cast %179 : vector<1x8x128xf32> to vector<8x128xf32>
    %181 = arith.addf %178, %180 : vector<8x128xf32>
    %c96 = arith.constant 96 : index
    %c0_116 = arith.constant 0 : index
    %182 = vector.load %arg8[%c96, %c0_116] : memref<128x128xf32, #tpu.memory_space<vmem>>, vector<8x128xf32>
    tpu.vector_store %arg8[%c96, %c0_116], %181 {strides = array<i32>} : memref<128x128xf32, #tpu.memory_space<vmem>>, vector<8x128xf32>,
    %c13 = arith.constant 13 : index
    %c0_117 = arith.constant 0 : index
    %c0_118 = arith.constant 0 : index
    %183 = vector.load %arg6[%c13, %c0_117, %c0_118] : memref<16x8x128xf32, #tpu.memory_space<vmem>>, vector<1x8x128xf32>
    %184 = vector.shape_cast %183 : vector<1x8x128xf32> to vector<8x128xf32>
    %185 = arith.mulf %184, %181 : vector<8x128xf32>
    %c13_119 = arith.constant 13 : index
    %c0_120 = arith.constant 0 : index
    %c0_121 = arith.constant 0 : index
    %186 = vector.load %arg7[%c13_119, %c0_120, %c0_121] : memref<16x8x128xf32, #tpu.memory_space<vmem>>, vector<1x8x128xf32>
    %187 = vector.shape_cast %186 : vector<1x8x128xf32> to vector<8x128xf32>
    %188 = arith.addf %185, %187 : vector<8x128xf32>
    %c104 = arith.constant 104 : index
    %c0_122 = arith.constant 0 : index
    %189 = vector.load %arg8[%c104, %c0_122] : memref<128x128xf32, #tpu.memory_space<vmem>>, vector<8x128xf32>
    tpu.vector_store %arg8[%c104, %c0_122], %188 {strides = array<i32>} : memref<128x128xf32, #tpu.memory_space<vmem>>, vector<8x128xf32>,
    %c14 = arith.constant 14 : index
    %c0_123 = arith.constant 0 : index
    %c0_124 = arith.constant 0 : index
    %190 = vector.load %arg6[%c14, %c0_123, %c0_124] : memref<16x8x128xf32, #tpu.memory_space<vmem>>, vector<1x8x128xf32>
    %191 = vector.shape_cast %190 : vector<1x8x128xf32> to vector<8x128xf32>
    %192 = arith.mulf %191, %188 : vector<8x128xf32>
    %c14_125 = arith.constant 14 : index
    %c0_126 = arith.constant 0 : index
    %c0_127 = arith.constant 0 : index
    %193 = vector.load %arg7[%c14_125, %c0_126, %c0_127] : memref<16x8x128xf32, #tpu.memory_space<vmem>>, vector<1x8x128xf32>
    %194 = vector.shape_cast %193 : vector<1x8x128xf32> to vector<8x128xf32>
    %195 = arith.addf %192, %194 : vector<8x128xf32>
    %c112 = arith.constant 112 : index
    %c0_128 = arith.constant 0 : index
    %196 = vector.load %arg8[%c112, %c0_128] : memref<128x128xf32, #tpu.memory_space<vmem>>, vector<8x128xf32>
    tpu.vector_store %arg8[%c112, %c0_128], %195 {strides = array<i32>} : memref<128x128xf32, #tpu.memory_space<vmem>>, vector<8x128xf32>,
    %c15 = arith.constant 15 : index
    %c0_129 = arith.constant 0 : index
    %c0_130 = arith.constant 0 : index
    %197 = vector.load %arg6[%c15, %c0_129, %c0_130] : memref<16x8x128xf32, #tpu.memory_space<vmem>>, vector<1x8x128xf32>
    %198 = vector.shape_cast %197 : vector<1x8x128xf32> to vector<8x128xf32>
    %199 = arith.mulf %198, %195 : vector<8x128xf32>
    %c15_131 = arith.constant 15 : index
    %c0_132 = arith.constant 0 : index
    %c0_133 = arith.constant 0 : index
    %200 = vector.load %arg7[%c15_131, %c0_132, %c0_133] : memref<16x8x128xf32, #tpu.memory_space<vmem>>, vector<1x8x128xf32>
    %201 = vector.shape_cast %200 : vector<1x8x128xf32> to vector<8x128xf32>
    %202 = arith.addf %199, %201 : vector<8x128xf32>
    %c120 = arith.constant 120 : index
    %c0_134 = arith.constant 0 : index
    %203 = vector.load %arg8[%c120, %c0_134] : memref<128x128xf32, #tpu.memory_space<vmem>>, vector<8x128xf32>
    tpu.vector_store %arg8[%c120, %c0_134], %202 {strides = array<i32>} : memref<128x128xf32, #tpu.memory_space<vmem>>, vector<8x128xf32>,
    %204 = vector.extract_strided_slice %66 {offsets = [0, 0], sizes = [16, 8], strides = [1, 1]} : vector<16x16xf32> to vector<16x8xf32>
    %205 = vector.extract_strided_slice %66 {offsets = [0, 8], sizes = [16, 8], strides = [1, 1]} : vector<16x16xf32> to vector<16x8xf32>
    %206 = tpu.concatenate %204, %205 in 0 : vector<16x8xf32>, vector<16x8xf32> -> vector<32x8xf32>
    %207 = tpu.concatenate %206, %206, %206, %206, %206, %206, %206, %206, %206, %206, %206, %206, %206, %206, %206, %206 in 1 : vector<32x8xf32>, vector<32x8xf32>, vector<32x8xf32>, vector<32x8xf32>, vector<32x8xf32>, vector<32x8xf32>, vector<32x8xf32>, vector<32x8xf32>, vector<32x8xf32>, vector<32x8xf32>, vector<32x8xf32>, vector<32x8xf32>, vector<32x8xf32>, vector<32x8xf32>, vector<32x8xf32>, vector<32x8xf32> -> vector<32x128xf32>
    %c8_135 = arith.constant 8 : index
    %c0_136 = arith.constant 0 : index
    %208 = vector.load %arg4[%c8_135, %c0_136] : memref<56x128xf32, #tpu.memory_space<vmem>>, vector<32x128xf32>
    %209 = arith.mulf %207, %208 : vector<32x128xf32>
    %210 = arith.truncf %209 : vector<32x128xf32> to vector<32x128xbf16>
    %c0_137 = arith.constant 0 : index
    %c0_138 = arith.constant 0 : index
    %211 = vector.load %arg8[%c0_137, %c0_138] : memref<128x128xf32, #tpu.memory_space<vmem>>, vector<128x128xf32>
    %212 = arith.truncf %211 : vector<128x128xf32> to vector<128x128xbf16>
    %cst_139 = arith.constant dense<0.000000e+00> : vector<32x128xf32>
    %213 = tpu.matmul %210, %212, %cst_139 {dimension_numbers = #tpu.dot_dimension_numbers<[1], [0], [0], [1], [0, 0, 1, 1], [], []>} : vector<32x128xbf16>, vector<128x128xbf16>, vector<32x128xf32> -> vector<32x128xf32>
    %214 = vector.extract_strided_slice %213 {offsets = [0, 0], sizes = [16, 64], strides = [1, 1]} : vector<32x128xf32> to vector<16x64xf32>
    %215 = vector.extract_strided_slice %213 {offsets = [16, 64], sizes = [16, 64], strides = [1, 1]} : vector<32x128xf32> to vector<16x64xf32>
    %216 = arith.addf %214, %215 : vector<16x64xf32>
    %c50_140 = arith.constant 50 : index
    %c64_141 = arith.constant 64 : index
    %217 = vector.load %arg4[%c50_140, %c64_141] : memref<56x128xf32, #tpu.memory_space<vmem>>, vector<1x64xf32>
    %218 = vector.broadcast %217 : vector<1x64xf32> to vector<16x64xf32>
    %219 = arith.mulf %218, %50 : vector<16x64xf32>
    %220 = arith.addf %216, %219 : vector<16x64xf32>
    %cst_142 = arith.constant 0.000000e+00 : f32
    %221 = vector.broadcast %cst_142 : f32 to vector<16x64xf32>
    %222 = arith.subf %221, %6 : vector<16x64xf32>
    %223 = math.exp %222 : vector<16x64xf32>
    %cst_143 = arith.constant 1.000000e+00 : f32
    %224 = vector.broadcast %cst_143 : f32 to vector<16x64xf32>
    %225 = arith.addf %224, %223 : vector<16x64xf32>
    %226 = tpu.reciprocal %225 {approx = true} : vector<16x64xf32> -> vector<16x64xf32>
    %227 = arith.mulf %6, %226 : vector<16x64xf32>
    %228 = arith.mulf %220, %227 : vector<16x64xf32>
    %c40_144 = arith.constant 40 : index
    %c0_145 = arith.constant 0 : index
    %229 = vector.load %arg4[%c40_144, %c0_145] : memref<56x128xf32, #tpu.memory_space<vmem>>, vector<8x64xf32>
    %230 = arith.truncf %228 : vector<16x64xf32> to vector<16x64xbf16>
    %231 = arith.truncf %229 : vector<8x64xf32> to vector<8x64xbf16>
    %cst_146 = arith.constant dense<0.000000e+00> : vector<16x8xf32>
    %232 = tpu.matmul %230, %231, %cst_146 {dimension_numbers = #tpu.dot_dimension_numbers<[1], [1], [0], [0], [0, 0, 1, 0], [], []>} : vector<16x64xbf16>, vector<8x64xbf16>, vector<16x8xf32> -> vector<16x8xf32>
    %233 = arith.addf %232, %7 : vector<16x8xf32>
    %c51_147 = arith.constant 51 : index
    %c64_148 = arith.constant 64 : index
    %234 = vector.load %arg4[%c51_147, %c64_148] : memref<56x128xf32, #tpu.memory_space<vmem>>, vector<1x8xf32>
    %235 = vector.broadcast %234 : vector<1x8xf32> to vector<16x8xf32>
    %236 = arith.addf %233, %235 : vector<16x8xf32>
    %c0_149 = arith.constant 0 : index
    %c0_150 = arith.constant 0 : index
    %c0_151 = arith.constant 0 : index
    %237 = vector.load %arg5[%c0_149, %c0_150, %c0_151] : memref<1x16x8xf32, #tpu.memory_space<vmem>>, vector<1x16x8xf32>
    %238 = vector.shape_cast %237 : vector<1x16x8xf32> to vector<16x8xf32>
    %239 = vector.shape_cast %236 : vector<16x8xf32> to vector<1x16x8xf32>
    tpu.vector_store %arg5[%c0_149, %c0_150, %c0_151], %239 {strides = array<i32>} : memref<1x16x8xf32, #tpu.memory_space<vmem>>, vector<1x16x8xf32>,
    return
  }
  func.func @transform_0(%arg0: i32) -> (i32, i32, i32) {
    %c0_i32 = arith.constant 0 : i32
    %c0_i32_0 = arith.constant 0 : i32
    %c0_i32_1 = arith.constant 0 : i32
    return %arg0, %c0_i32, %c0_i32_0 : i32, i32, i32
  }
  func.func @transform_1(%arg0: i32) -> (i32, i32) {
    %c0_i32 = arith.constant 0 : i32
    %c0_i32_0 = arith.constant 0 : i32
    %c0_i32_1 = arith.constant 0 : i32
    return %c0_i32, %c0_i32_0 : i32, i32
  }
  func.func @transform_2(%arg0: i32) -> (i32, i32) {
    %c0_i32 = arith.constant 0 : i32
    %c0_i32_0 = arith.constant 0 : i32
    %c0_i32_1 = arith.constant 0 : i32
    return %c0_i32, %c0_i32_0 : i32, i32
  }
  func.func @transform_3(%arg0: i32) -> (i32, i32) {
    %c0_i32 = arith.constant 0 : i32
    %c0_i32_0 = arith.constant 0 : i32
    %c0_i32_1 = arith.constant 0 : i32
    return %c0_i32, %c0_i32_0 : i32, i32
  }
  func.func @transform_4(%arg0: i32) -> (i32, i32, i32) {
    %c0_i32 = arith.constant 0 : i32
    %c0_i32_0 = arith.constant 0 : i32
    %c0_i32_1 = arith.constant 0 : i32
    return %arg0, %c0_i32, %c0_i32_0 : i32, i32, i32
  }
}

</mosaic_0001>

<bundles_post_ra>
// kernel: mamba_forward.1
= control target key start
LH: loop header
LB: loop body
LE: loop exit
PB: predicated region body
PF: predicated region fallthrough
CT: control target
= control target key end

     0   :  { %s2218_s15 = smov 0   ;;  %s3027_s0 = inlined_call_operand.vmem [shape: f32[4,16,32], index: 0, kind: input, shape index: {}]   ;;  %s3028_s1 = inlined_call_operand.vmem [shape: bf16[136,32], index: 1, kind: input, shape index: {}]   ;;  %s3029_s2 = inlined_call_operand.vmem [shape: bf16[96,64], index: 2, kind: input, shape index: {}]   ;;  %s3030_s3 = inlined_call_operand.vmem [shape: f32[56,128], index: 3, kind: input, shape index: {}]   ;;  %s3031_s4 = inlined_call_operand.vmem [shape: f32[4,16,8], index: 4, kind: output, shape index: {}]  }
   0x1 LB: > { %s1970_s16 = sadd.s32 4294967295, %s2172_s15   ;;  %p1974_p0 = scmp.ge.s32.totalorder %s2172_s15, 1  ;;  %s2172_s15 = sphi %s2218_s15, %s14_s15  }
   0x2   : > { %p162_p1 = scmp.lt.s32.totalorder %s2172_s15, 5 }
   0x4   : > { %p163_p2 = pnand %p1974_p0, %p162_p1 }
   0x6   : > { %166 = sbr.rel (%p163_p2) target bundleno = 1729 (0x6c1), region = 36 }
   0xd   : > { %v2095_v0 = vld [vmem:[%s3028_s1] sm:$0xff]   ;;  %v2174_v1 = vmov 0   ;;  %vm262_vm0 = vcmask 261120   ;;  %v2096_v3 = vld [vmem:[%s3028_s1 + $0x8] sm:$0xff]   ;;  %v2097_v5 = vld [vmem:[%s3028_s1 + $0x10] sm:$0xff]   ;;  %p188_p3 = scmp.lt.s32.totalorder %s1970_s16, 3  ;;  %v336_v22 = vlaneseq }
   0xe   : > { %293 = vmatprep.subr.bf16.mxu0 %v2174_v1  ;;  %325 = vmatprep.mubr.bf16.mxu0 %v2174_v1  ;;  %v267_v2 = vsel %vm262_vm0, %v2095_v0, 0  ;;  %v270_v4 = vsel %vm262_vm0, %v2096_v3, 0  ;;  %v273_v6 = vsel %vm262_vm0, %v2097_v5, 0  ;;  %v2098_v7 = vld [vmem:[%s3028_s1 + $0x18] sm:$0xff]   ;;  %v2099_v9 = vld [vmem:[%s3028_s1 + $0x20] sm:$0xff]   ;;  %v2100_v11 = vld [vmem:[%s3028_s1 + $0x28] sm:$0xff]  }
   0xf   : > { %294 = vmatpush1.bf16.xpose.msra.mxu0 %v267_v2  ;;  %v276_v8 = vsel %vm262_vm0, %v2098_v7, 0  ;;  %v279_v10 = vsel %vm262_vm0, %v2099_v9, 0  ;;  %v282_v12 = vsel %vm262_vm0, %v2100_v11, 0  ;;  %v2101_v13 = vld [vmem:[%s3028_s1 + $0x30] sm:$0xff]   ;;  %v2102_v15 = vld [vmem:[%s3028_s1 + $0x38] sm:$0xff]   ;;  %s3053_s16 = smov (!%p188_p3, %s1970_s16), 3 }
  0x10   : > { %295 = vmatprep.subr.bf16.mxu0 %v2174_v1  ;;  %v285_v14 = vsel %vm262_vm0, %v2101_v13, 0  ;;  %v288_v16 = vsel %vm262_vm0, %v2102_v15, 0  ;;  %v2103_v17 = vld [vmem:[%s3028_s1 + $0x40] ss:$0 sps:$4 sm:$0xff]   ;;  %s2005_s9 = sshll.u32 %s3053_s16, 4  ;;  %v2275_v23 = vshrl.u32 %v336_v22, 7 }
  0x11   : > { %v291_v18 = vsel %vm262_vm0, %v2103_v17, 0  ;;  %s192_s12 = scalar_lea.vmem %s3027_s0, %s2005_s9  ;;  %v1990_v27 = vld [vmem:[%s3030_s3 + $0x31] ss:$0 sm:$0xff]  ;;  %v2291_v28 = vld [vmem:[%s3030_s3 + $0x30] ss:$0 sm:$0xff]  ;;  %s2175_s21 = smov 64  }
  0x12   : > { %v199_v19 = vld [vmem:[%s192_s12] sm:$0xff]  ;;  %v200_v20 = vld [vmem:[%s192_s12 + $0x8] sm:$0xff]  ;;  %vm368_vm1 = vcmp.lt.s32.totalorder %v2275_v23, 2  ;;  %vm347_vm2 = vcmp.lt.s32.totalorder %v2275_v23, 3  ;;  %vm394_vm3 = vcmp.lt.s32.totalorder %v2275_v23, 1  ;;  %vm350_vm4 = vcmp.ge.s32.totalorder %v2275_v23, 3 }
  0x13   : > { %v201_v21 = vpack.c.bf16 %v200_v20, %v199_v19  ;;  %v1991_v42 = vld [vmem:[%s3030_s3 + $0x32] ss:$0 sm:$0xff]  ;;  %vm371_vm5 = vcmp.ge.s32.totalorder %v2275_v23, 2  ;;  %vm397_vm6 = vcmp.ge.s32.totalorder %v2275_v23, 1  ;;  %v1992_v52 = vld [vmem:[%s3030_s3 + $0x33] ss:$0 sm:$0xff] }
  0x14   : > { %v2104_v55 = vld [vmem:[%s3029_s2] sm:$0xff]   ;;  %vm493_vm7 = vcmask 523264   ;;  %v2176_v56 = vmov 0.0   ;;  %v2105_v58 = vld [vmem:[%s3029_s2 + $0x8] sm:$0xff]   ;;  %v2106_v60 = vld [vmem:[%s3029_s2 + $0x10] sm:$0xff]   ;;  %vm2177_vm8 = vmmov 0  }
  0x15   : > { %2026 = vmatprep.subr.bf16.mxu1 %v2176_v56  ;;  %v498_v57 = vsel %vm493_vm7, %v2104_v55, 0  ;;  %v501_v59 = vsel %vm493_vm7, %v2105_v58, 0  ;;  %v504_v61 = vsel %vm493_vm7, %v2106_v60, 0  ;;  %v2107_v62 = vld [vmem:[%s3029_s2 + $0x18] sm:$0xff]   ;;  %v2108_v0 = vld [vmem:[%s3029_s2 + $0x20] sm:$0xff]   ;;  %v2109_v2 = vld [vmem:[%s3029_s2 + $0x28] sm:$0xff]   ;;  %2038 = vmatprep.mubr.msk.bf16.mxu1 %vm2177_vm8, %v2176_v56 }
  0x16   : > { %2027 = vmatpush3.bf16.xpose.msra.mxu1 %v498_v57  ;;  %v507_v63 = vsel %vm493_vm7, %v2107_v62, 0  ;;  %v513_v3 = vsel %vm493_vm7, %v2109_v2, 0  ;;  %s2178_s11 = smov 48   ;;  %s2179_s12 = smov 120   ;;  %v913_v57 = vsub.s32 7, %v2275_v23  ;;  %vm1647_vm13 = vcmask 64512  }
  0x17   : > { %296 = vmatpush1.bf16.xpose.msra.mxu0 %v270_v4  ;;  %2028 = vmatprep.subr.bf16.mxu1 %v2176_v56  ;;  %s2180_s13 = smov 56   ;;  %s2181_s14 = smov 80   ;;  %vm1652_vm14 = vcmask 130048   ;;  %vm1657_vm15 = vcmask 195584  }
  0x18   : > { %297 = vmatprep.subr.bf16.mxu0 %v2174_v1  ;;  %s2182_s17 = smov 72   ;;  %s2183_s18 = smov 88  }
  0x19   : > { %s2184_s19 = smov 96   ;;  %s2185_s20 = smov 104  }
  0x1a   : > { %s2187_s22 = smov 112   ;;  %s2188_s23 = smov 8  }
  0x1b   : > { %s2189_s24 = smov 16   ;;  %s2190_s25 = smov 24  }
  0x1c   : > { %s2191_s26 = smov 32   ;;  %s2192_s27 = smov 40  }
  0x1e   : > { %2029 = vmatpush3.bf16.xpose.msra.mxu1 %v501_v59 }
  0x1f   : > { %298 = vmatpush1.bf16.xpose.msra.mxu0 %v273_v6  ;;  %2030 = vmatprep.subr.bf16.mxu1 %v2176_v56 }
  0x20   : > { %299 = vmatprep.subr.bf16.mxu0 %v2174_v1 }
  0x26   : > { %2031 = vmatpush3.bf16.xpose.msra.mxu1 %v504_v61 }
  0x27   : > { %300 = vmatpush1.bf16.xpose.msra.mxu0 %v276_v8  ;;  %2032 = vmatprep.subr.bf16.mxu1 %v2176_v56 }
  0x28   : > { %301 = vmatprep.subr.bf16.mxu0 %v2174_v1 }
  0x2e   : > { %2033 = vmatpush3.bf16.xpose.msra.mxu1 %v507_v63 }
  0x2f   : > { %302 = vmatpush1.bf16.xpose.msra.mxu0 %v279_v10  ;;  %2034 = vmatprep.subr.bf16.mxu1 %v2176_v56 }
  0x30   : > { %303 = vmatprep.subr.bf16.mxu0 %v2174_v1 }
  0x37   : > { %304 = vmatpush1.bf16.xpose.msra.mxu0 %v282_v12 }
  0x38   : > { %305 = vmatprep.subr.bf16.mxu0 %v2174_v1 }
  0x3f   : > { %306 = vmatpush1.bf16.xpose.msra.mxu0 %v285_v14 }
  0x40   : > { %307 = vmatprep.subr.bf16.mxu0 %v2174_v1 }
  0x47   : > { %308 = vmatpush1.bf16.xpose.msra.mxu0 %v288_v16 }
  0x48   : > { %309 = vmatprep.subr.bf16.mxu0 %v2174_v1  ;;  %v510_v1 = vsel %vm493_vm7, %v2108_v0, 0 }
  0x49   : > { %2035 = vmatpush3.bf16.xpose.msra.mxu1 %v510_v1 }
  0x4a   : > { %2036 = vmatprep.subr.bf16.mxu1 %v2176_v56 }
  0x4f   : > { %310 = vmatpush1.bf16.xpose.msra.mxu0 %v291_v18 }
  0x50   : > { %2062 = vmatprep.subr.bf16.mxu0 %v2176_v56 }
  0x51   : > { %2037 = vmatpush3.bf16.xpose.msra.mxu1 %v513_v3 }
  0x56   : > { %1988 = vmatmul.mubr.msk.bf16.vlgmr.msra.gmra.mrb[0].mxu0 %vm262_vm0, %v201_v21 }
  0x57   : > { %2064 = vmatprep.mubr.msk.bf16.mxu0 %vm2177_vm8, %v2176_v56  ;;  %vm1695_vm8 = vcmask 719872  }
 0x129   : > { %v2277_v24 = vpop.f32.mrb[0].mxu0 }
 0x12a   : > { %3036 = vst [vmem:[#allocation5_spill] sm:$0xff] %v2277_v24  ;;  %v2279_v25 = vpop.f32.mrb[1].mxu0  ;;  %v366_v30 = vrot.slane %v2277_v24, 6  ;;  %v345_v32 = vrot.slane %v2277_v24, 5  ;;  %v392_v34 = vrot.slane %v2277_v24, 7  ;;  %v423_v54 = vmul.f32 %v1992_v52, %v2277_v24 }
 0x12b   : > { %3037 = vst [vmem:[#allocation6_spill] sm:$0xff] %v2279_v25  ;;  %v2283_v26 = vpop.f32.mrb[2].mxu0 }
 0x12c   : > { %3038 = vst [vmem:[#allocation7_spill] sm:$0xff] %v2283_v26  ;;  %v2294_v29 = vpop.f32.mrb[3].mxu0  ;;  %v367_v31 = vrot.slane %v2283_v26, 6  ;;  %v346_v33 = vrot.slane %v2283_v26, 5  ;;  %v393_v35 = vrot.slane %v2283_v26, 7  ;;  %v424_v53 = vmul.f32 %v1992_v52, %v2283_v26 }
 0x12d   : > { %3039 = vst [vmem:[#allocation8_spill] sm:$0xff] %v2294_v29 }
 0x12e   : > { %v369_v36 = vsel %vm368_vm1, %v366_v30, %v367_v31  ;;  %v348_v37 = vsel %vm347_vm2, %v345_v32, %v346_v33  ;;  %v395_v40 = vsel %vm394_vm3, %v392_v34, %v393_v35  ;;  %v349_v41 = vsel %vm347_vm2, %v346_v33, %v345_v32 }
 0x12f   : > { %v381_v38 = vmul.f32 %v1990_v27, %v369_v36  ;;  %v355_v39 = vmul.f32 %v2291_v28, %v348_v37  ;;  %v352_v43 = vsel %vm350_vm4, %v349_v41, 0.0  ;;  %v370_v44 = vsel %vm368_vm1, %v367_v31, %v366_v30 }
 0x130   : > { %v396_v45 = vsel %vm394_vm3, %v393_v35, %v392_v34  ;;  %v407_v46 = vmul.f32 %v1991_v42, %v395_v40  ;;  %v354_v47 = vmul.f32 %v2291_v28, %v352_v43  ;;  %v373_v48 = vsel %vm371_vm5, %v370_v44, 0.0 }
 0x131   : > { %386 = vrot.lane.b32.xlu1 %v381_v38, %s2175_s21  ;;  %360 = vrot.lane.b32.xlu0 %v355_v39, %s2175_s21  ;;  %v399_v49 = vsel %vm397_vm6, %v396_v45, 0.0  ;;  %v380_v50 = vmul.f32 %v1990_v27, %v373_v48  ;;  %v865_v43 = vsub.s32 1, %v2275_v23  ;;  %v2396_v44 = vsub.s32 0, %v2275_v23 }
 0x132   : > { %v406_v51 = vmul.f32 %v1991_v42, %v399_v49  ;;  %v897_v49 = vsub.s32 5, %v2275_v23  ;;  %vm1666_vm1 = vcmask 326656   ;;  %vm1671_vm2 = vcmask 392192  }
 0x133   : > { %vm1676_vm3 = vcmask 457728   ;;  %vm1685_vm4 = vcmask 588800   ;;  %vm1690_vm5 = vcmask 654336   ;;  %vm1700_vm6 = vcmask 785408  }
 0x135   : > { %412 = vrot.lane.b32.xlu1 %v407_v46, %s2175_s21  ;;  %358 = vrot.lane.b32.xlu0 %v354_v47, %s2175_s21  ;;  %v881_v46 = vsub.s32 3, %v2275_v23 }
 0x139   : > { %384 = vrot.lane.b32.xlu1 %v380_v50, %s2175_s21  ;;  %410 = vrot.lane.b32.xlu0 %v406_v51, %s2175_s21  ;;  %v873_v50 = vsub.s32 2, %v2275_v23 }
 0x13d   : > { %429 = vrot.lane.b32.xlu1 %v424_v53, %s2175_s21  ;;  %427 = vrot.lane.b32.xlu0 %v423_v54, %s2175_s21  ;;  %v905_v53 = vsub.s32 6, %v2275_v23  ;;  %v889_v54 = vsub.s32 4, %v2275_v23 }
 0x141   : > { %557 = vrot.lane.b32.xlu1 %v1990_v27, %s2175_s21 }
 0x1a3   : > { %v387_v4 = vpop.permute.xlu1 %386  ;;  %v361_v5 = vpop.permute.xlu0 %360 }
 0x1a4   : > { %v365_v6 = vadd.f32 %v2291_v28, %v361_v5 }
 0x1a6   : > { %v391_v9 = vadd.f32 %v387_v4, %v365_v6 }
 0x1a7   : > { %v413_v7 = vpop.permute.xlu1 %412  ;;  %v359_v8 = vpop.permute.xlu0 %358 }
 0x1a8   : > { %v364_v10 = vadd.f32 %v2291_v28, %v359_v8  ;;  %v417_v14 = vadd.f32 %v413_v7, %v391_v9 }
 0x1ab   : > { %v385_v11 = vpop.permute.xlu1 %384  ;;  %v411_v12 = vpop.permute.xlu0 %410 }
 0x1ac   : > { %v390_v13 = vadd.f32 %v385_v11, %v364_v10 }
 0x1ae   : > { %v416_v15 = vadd.f32 %v411_v12, %v390_v13 }
 0x1af   : > { %v430_v16 = vpop.permute.xlu1 %429  ;;  %v428_v17 = vpop.permute.xlu0 %427 }
 0x1b0   : > { %v434_v18 = vadd.f32 %v430_v16, %v417_v14  ;;  %v433_v19 = vadd.f32 %v428_v17, %v416_v15 }
 0x1b2   : > { %v436_v20 = vsub.f32 0.0, %v434_v18  ;;  %v435_v21 = vsub.f32 0.0, %v433_v19 }
 0x1b3   : > { %v558_v58 = vpop.permute.xlu1 %557 }
 0x1b4   : > { %v439_v22 = vmul.f32 1.442695, %v436_v20  ;;  %v437_v27 = vmul.f32 1.442695, %v435_v21 }
 0x1b6   : > { %2110 = vpow2.f32 %v439_v22 }
 0x1b7   : > { %2112 = vpow2.f32 %v437_v27 }
 0x1c0   : > { %v2111_v30 = vpop.eup %2110 }
 0x1c1   : > { %v2113_v31 = vpop.eup %2112  ;;  %v442_v32 = vadd.f32 1.0, %v2111_v30 }
 0x1c2   : > { %v441_v33 = vadd.f32 1.0, %v2113_v31 }
 0x1c3   : > { %2114 = vrcp.f32 %v442_v32 }
 0x1c4   : > { %2116 = vrcp.f32 %v441_v33 }
 0x1cd   : > { %v2115_v28 = vpop.eup %2114 }
 0x1ce   : > { %v2117_v34 = vpop.eup %2116  ;;  %v2362_v35 = vmul.f32 %v2115_v28, %v434_v18 }
 0x1cf   : > { %v2364_v36 = vmul.f32 %v2117_v34, %v433_v19 }
 0x1d0   : > { %849 = vrot.lane.b32.xlu1 %v2362_v35, %s2175_s21 }
 0x1d1   : > { %v447_v37 = vpack.c.bf16 %v2362_v35, %v2364_v36 }
 0x1d3   : > { %461 = vrot.lane.b32.xlu0 %v447_v37, %s2175_s21 }
 0x1d7   : > { %847 = vrot.lane.b32.xlu0 %v2364_v36, %s2175_s21 }
 0x242   : > { %v2459_v33 = vpop.permute.xlu1 %849 }
 0x245   : > { %v462_v38 = vpop.permute.xlu0 %461 }
 0x246   : > { %2039 = vmatmul.mubr.msk.bf16.vlgmr.msra.gmra.mrb[0].mxu1 %vm493_vm7, %v462_v38 }
 0x249   : > { %v848_v28 = vpop.permute.xlu0 %847 }
 0x319   : > { %v2374_v39 = vpop.f32.mrb[0].mxu1 }
 0x31a   : > { %1473 = vrot.lane.b32.xlu0 %v2374_v39, %s2178_s11  ;;  %1467 = vrot.lane.b32.xlu1 %v2374_v39, %s2179_s12  ;;  %v2040_v40 = vpop.f32.mrb[1].mxu1  ;;  %v866_v45 = vrot.slane %v2374_v39, %v865_v43  ;;  %v882_v47 = vrot.slane %v2374_v39, %v881_v46  ;;  %v858_v48 = vrot.slane %v2374_v39, %v2396_v44 }
 0x31b   : > { %v2380_v41 = vpop.f32.mrb[2].mxu1  ;;  %v898_v51 = vrot.slane %v2374_v39, %v897_v49  ;;  %v874_v52 = vrot.slane %v2374_v39, %v873_v50  ;;  %v906_v55 = vrot.slane %v2374_v39, %v905_v53  ;;  %v890_v56 = vrot.slane %v2374_v39, %v889_v54 }
 0x31c   : > { %v2041_v42 = vpop.f32.mrb[3].mxu1  ;;  %v914_v59 = vrot.slane %v2374_v39, %v913_v57  ;;  %v561_v60 = vadd.f32 %v558_v58, %v2380_v41  ;;  %v930_v1 = vrot.slane %v2380_v41, %v865_v43  ;;  %v938_v2 = vrot.slane %v2380_v41, %v873_v50 }
 0x31d   : > { %v954_v3 = vrot.slane %v2380_v41, %v889_v54  ;;  %v560_v5 = vadd.f32 %v558_v58, %v2374_v39  ;;  %v970_v7 = vrot.slane %v2380_v41, %v905_v53  ;;  %v2444_v12 = vrot.slane %v2380_v41, %v913_v57 }
 0x31e   : > { %1485 = vrot.lane.b32.xlu0 %v2374_v39, %s2180_s13  ;;  %1497 = vrot.lane.b32.xlu1 %v2374_v39, %s2175_s21  ;;  %v565_v61 = vmin.f32 %v561_v60, 20.0  ;;  %v922_v13 = vrot.slane %v2380_v41, %v2396_v44  ;;  %v946_v17 = vrot.slane %v2380_v41, %v881_v46  ;;  %vm563_vm10 = vcmp.gt.f32.partialorder %v561_v60, 20.0 }
 0x31f   : > { %v564_v9 = vmin.f32 %v560_v5, 20.0  ;;  %v962_v19 = vrot.slane %v2380_v41, %v897_v49  ;;  %vm562_vm12 = vcmp.gt.f32.partialorder %v560_v5, 20.0 }
 0x320   : > { %v568_v62 = vmul.f32 1.442695, %v565_v61 }
 0x321   : > { %v566_v15 = vmul.f32 1.442695, %v564_v9 }
 0x322   : > { %1521 = vrot.lane.b32.xlu0 %v2374_v39, %s2181_s14  ;;  %1509 = vrot.lane.b32.xlu1 %v2374_v39, %s2182_s17  ;;  %2118 = vpow2.f32 %v568_v62 }
 0x326   : > { %1533 = vrot.lane.b32.xlu0 %v2374_v39, %s2183_s18  ;;  %1545 = vrot.lane.b32.xlu1 %v2374_v39, %s2184_s19 }
 0x32a   : > { %1557 = vrot.lane.b32.xlu1 %v2374_v39, %s2185_s20  ;;  %1185 = vbcast.lane.b32.xlu0 %v866_v45, 328 }
 0x32c   : > { %v2119_v63 = vpop.eup %2118 }
 0x32d   : > { %v579_v0 = vadd.f32 1.0, %v2119_v63  ;;  %v582_v4 = vmul.f32 -0.5, %v2119_v63  ;;  %v585_v10 = vand.u32 2147483647, %v2119_v63 }
 0x32e   : > { %1193 = vbcast.lane.b32.xlu0 %v882_v47, 328  ;;  %1181 = vbcast.lane.b32.xlu1 %v858_v48, 328 }
 0x32f   : > { %2120 = vlog2.f32 %v579_v0  ;;  %v583_v8 = vadd.f32 1.0, %v582_v4  ;;  %vm586_vm9 = vcmp.lt.f32.partialorder %v585_v10, 0.0004427343 }
 0x330   : > { %2122 = vpow2.f32 %v566_v15 }
 0x331   : > { %v584_v14 = vmul.f32 %v2119_v63, %v583_v8 }
 0x332   : > { %1201 = vbcast.lane.b32.xlu0 %v898_v51, 328  ;;  %1189 = vbcast.lane.b32.xlu1 %v874_v52, 328 }
 0x336   : > { %1205 = vbcast.lane.b32.xlu0 %v906_v55, 328  ;;  %1197 = vbcast.lane.b32.xlu1 %v890_v56, 328 }
 0x339   : > { %v2121_v6 = vpop.eup %2120 }
 0x33a   : > { %1209 = vbcast.lane.b32.xlu1 %v914_v59, 328  ;;  %1469 = vrot.lane.b32.xlu0 %v2380_v41, %s2179_s12  ;;  %v581_v11 = vmul.f32 0.6931472, %v2121_v6  ;;  %v2123_v20 = vpop.eup %2122 }
 0x33b   : > { %v570_v21 = vadd.f32 1.0, %v2123_v20  ;;  %v573_v22 = vmul.f32 -0.5, %v2123_v20  ;;  %v576_v31 = vand.u32 2147483647, %v2123_v20 }
 0x33c   : > { %v587_v16 = vsel %vm586_vm9, %v584_v14, %v581_v11  ;;  %vm1705_vm9 = vcmask 850944  }
 0x33d   : > { %v2452_v18 = vsel %vm563_vm10, %v561_v60, %v587_v16  ;;  %2124 = vlog2.f32 %v570_v21  ;;  %v574_v30 = vadd.f32 1.0, %v573_v22  ;;  %vm577_vm11 = vcmp.lt.f32.partialorder %v576_v31, 0.0004427343 }
 0x33e   : > { %869 = vbcast.lane.b32.xlu1 %v866_v45, 320  ;;  %861 = vbcast.lane.b32.xlu0 %v858_v48, 320  ;;  %v2186_v48 = vmov 1966171168   ;;  %vm1715_vm10 = vcmask 982016  }
 0x33f   : > { %v575_v34 = vmul.f32 %v2123_v20, %v574_v30  ;;  %v605_v49 = vunpack.c.l.s4 %v2186_v48 }
 0x342   : > { %877 = vbcast.lane.b32.xlu1 %v874_v52, 320  ;;  %885 = vbcast.lane.b32.xlu0 %v882_v47, 320  ;;  %v606_v52 = vunpack.c.0.s8 %v605_v49 }
 0x346   : > { %1475 = vrot.lane.b32.xlu1 %v2380_v41, %s2178_s11  ;;  %893 = vbcast.lane.b32.xlu0 %v890_v56, 320 }
 0x347   : > { %v2125_v27 = vpop.eup %2124 }
 0x348   : > { %v572_v32 = vmul.f32 0.6931472, %v2125_v27 }
 0x34a   : > { %1487 = vrot.lane.b32.xlu1 %v2380_v41, %s2180_s13  ;;  %901 = vbcast.lane.b32.xlu0 %v898_v51, 320  ;;  %v578_v37 = vsel %vm577_vm11, %v575_v34, %v572_v32 }
 0x34b   : > { %v2467_v42 = vsel %vm562_vm12, %v560_v5, %v578_v37 }
 0x34c   : > { %v853_v56 = vmul.f32 %v848_v28, %v2467_v42 }
 0x34e   : > { %1523 = vrot.lane.b32.xlu1 %v2380_v41, %s2181_s14  ;;  %909 = vbcast.lane.b32.xlu0 %v906_v55, 320  ;;  %v2502_v55 = vsub.s32 %v606_v52, %v2275_v23 }
 0x352   : > { %1535 = vrot.lane.b32.xlu1 %v2380_v41, %s2183_s18  ;;  %917 = vbcast.lane.b32.xlu0 %v914_v59, 320  ;;  %v992_v59 = vrot.slane %v853_v56, %v2502_v55 }
 0x354   : > { %v1000_v62 = vcombine.high %v992_v59, %v992_v59 }
 0x356   : > { %1499 = vrot.lane.b32.xlu0 %v2380_v41, %s2175_s21  ;;  %1217 = vbcast.lane.b32.xlu1 %v930_v1, 328  ;;  %v1022_v23 = vrot.slane %v1000_v62, %v2502_v55 }
 0x358   : > { %v1090_v6 = vrot.slane %v1022_v23, %v2396_v44 }
 0x35a   : > { %1511 = vrot.lane.b32.xlu0 %v2380_v41, %s2182_s17  ;;  %1221 = vbcast.lane.b32.xlu1 %v938_v2, 328 }
 0x35e   : > { %1547 = vrot.lane.b32.xlu0 %v2380_v41, %s2184_s19  ;;  %1229 = vbcast.lane.b32.xlu1 %v954_v3, 328 }
 0x362   : > { %1559 = vrot.lane.b32.xlu0 %v2380_v41, %s2185_s20  ;;  %1237 = vbcast.lane.b32.xlu1 %v970_v7, 328 }
 0x366   : > { %1241 = vbcast.lane.b32.xlu1 %v2444_v12, 328  ;;  %1213 = vbcast.lane.b32.xlu0 %v922_v13, 328 }
 0x36a   : > { %1225 = vbcast.lane.b32.xlu0 %v946_v17, 328  ;;  %595 = vrot.lane.b32.xlu1 %v2452_v18, %s2175_s21 }
 0x36e   : > { %1233 = vbcast.lane.b32.xlu0 %v962_v19, 328 }
 0x372   : > { %925 = vbcast.lane.b32.xlu0 %v922_v13, 320 }
 0x376   : > { %933 = vbcast.lane.b32.xlu0 %v930_v1, 320  ;;  %v985_v1 = vcombine.high %v853_v56, %v853_v56 }
 0x378   : > { %v999_v5 = vrot.slane %v985_v1, %v2502_v55 }
 0x37a   : > { %941 = vbcast.lane.b32.xlu0 %v938_v2, 320  ;;  %v1008_v2 = vrot.slane %v992_v59, %v2502_v55  ;;  %v1001_v15 = vcombine.high %v999_v5, %v999_v5  ;;  %v1015_v16 = vrot.slane %v999_v5, %v2502_v55 }
 0x37c   : > { %v1030_v8 = vcombine.high %v1008_v2, %v1008_v2  ;;  %v1029_v22 = vrot.slane %v1001_v15, %v2502_v55  ;;  %v2552_v27 = vrot.slane %v1015_v16, %v2396_v44  ;;  %v1031_v34 = vcombine.high %v1015_v16, %v1015_v16 }
 0x37d   : > { %v2565_v49 = vrot.slane %v1008_v2, %v2396_v44 }
 0x37e   : > { %949 = vbcast.lane.b32.xlu0 %v946_v17, 320  ;;  %v1094_v14 = vrot.slane %v1030_v8, %v2396_v44  ;;  %v2562_v28 = vrot.slane %v1029_v22, %v2396_v44  ;;  %v2577_v62 = vrot.slane %v1031_v34, %v2396_v44  ;;  %v1033_v1 = vcombine.high %v1029_v22, %v1029_v22 }
 0x380   : > { %v2587_v8 = vrot.slane %v1033_v1, %v2396_v44  ;;  %v854_v1 = vmul.f32 %v2459_v33, %v2452_v18 }
 0x382   : > { %957 = vbcast.lane.b32.xlu0 %v954_v3, 320 }
 0x386   : > { %965 = vbcast.lane.b32.xlu0 %v962_v19, 320 }
 0x38a   : > { %973 = vbcast.lane.b32.xlu0 %v970_v7, 320  ;;  %v1032_v7 = vcombine.high %v1022_v23, %v1022_v23 }
 0x38c   : > { %v2461_v38 = vpop.permute.xlu1 %1467  ;;  %v2463_v40 = vpop.permute.xlu0 %1473  ;;  %v2537_v13 = vrot.slane %v1032_v7, %v2396_v44 }
 0x38d   : > { %1477 = vrot.lane.b32.xlu1 %v2461_v38, %s2178_s11 }
 0x38e   : > { %593 = vrot.lane.b32.xlu0 %v2467_v42, %s2175_s21 }
 0x390   : > { %v2471_v43 = vpop.permute.xlu1 %1497  ;;  %v2473_v45 = vpop.permute.xlu0 %1485 }
 0x391   : > { %1489 = vrot.lane.b32.xlu1 %v2461_v38, %s2180_s13 }
 0x392   : > { %1513 = vrot.lane.b32.xlu0 %v2461_v38, %s2182_s17 }
 0x394   : > { %v2479_v46 = vpop.permute.xlu1 %1509  ;;  %v2481_v47 = vpop.permute.xlu0 %1521 }
 0x395   : > { %1501 = vrot.lane.b32.xlu1 %v2461_v38, %s2175_s21 }
 0x396   : > { %1525 = vrot.lane.b32.xlu0 %v2461_v38, %s2181_s14 }
 0x398   : > { %v2487_v50 = vpop.permute.xlu1 %1545  ;;  %v2489_v51 = vpop.permute.xlu0 %1533 }
 0x399   : > { %1537 = vrot.lane.b32.xlu1 %v2461_v38, %s2183_s18 }
 0x39a   : > { %1561 = vrot.lane.b32.xlu0 %v2461_v38, %s2185_s20 }
 0x39c   : > { %v2495_v53 = vpop.permute.xlu1 %1557  ;;  %v2497_v54 = vpop.permute.xlu0 %1185 }
 0x39d   : > { %1549 = vrot.lane.b32.xlu1 %v2461_v38, %s2184_s19  ;;  %v1244_v7 = vmul.f32 %v2497_v54, %v1090_v6 }
 0x3a0   : > { %v1182_v57 = vpop.permute.xlu1 %1181  ;;  %v2505_v58 = vpop.permute.xlu0 %1193 }
 0x3a1   : > { %v1243_v59 = vmul.f32 %v1182_v57, %v2565_v49 }
 0x3a4   : > { %v2508_v60 = vpop.permute.xlu1 %1189  ;;  %v2510_v61 = vpop.permute.xlu0 %1201 }
 0x3a5   : > { %v1245_v16 = vmul.f32 %v2508_v60, %v1094_v14 }
 0x3a8   : > { %v2512_v63 = vpop.permute.xlu1 %1197  ;;  %v2514_v0 = vpop.permute.xlu0 %1205 }
 0x3ac   : > { %v2518_v3 = vpop.permute.xlu1 %1209  ;;  %v2520_v4 = vpop.permute.xlu0 %1469 }
 0x3ad   : > { %1515 = vrot.lane.b32.xlu1 %v2520_v4, %s2182_s17  ;;  %1479 = vrot.lane.b32.xlu0 %v2520_v4, %s2178_s11 }
 0x3b0   : > { %v870_v9 = vpop.permute.xlu1 %869  ;;  %v2528_v10 = vpop.permute.xlu0 %861 }
 0x3b1   : > { %v2530_v11 = vmul.f32 %v1090_v6, %v870_v9  ;;  %1527 = vrot.lane.b32.xlu1 %v2520_v4, %s2181_s14  ;;  %1491 = vrot.lane.b32.xlu0 %v2520_v4, %s2180_s13 }
 0x3b4   : > { %v878_v17 = vpop.permute.xlu1 %877  ;;  %v886_v19 = vpop.permute.xlu0 %885 }
 0x3b5   : > { %v2541_v20 = vmul.f32 %v1094_v14, %v878_v17  ;;  %v2544_v21 = vmul.f32 %v2537_v13, %v886_v19  ;;  %1563 = vrot.lane.b32.xlu1 %v2520_v4, %s2185_s20  ;;  %1503 = vrot.lane.b32.xlu0 %v2520_v4, %s2175_s21 }
 0x3b8   : > { %v1476_v30 = vpop.permute.xlu1 %1475  ;;  %v894_v31 = vpop.permute.xlu0 %893 }
 0x3b9   : > { %v2555_v32 = vmul.f32 %v2552_v27, %v894_v31  ;;  %1571 = vrot.lane.b32.xlu1 %v2380_v41, %s2187_s22  ;;  %1539 = vrot.lane.b32.xlu0 %v2520_v4, %s2183_s18 }
 0x3bc   : > { %v1488_v37 = vpop.permute.xlu1 %1487  ;;  %v902_v48 = vpop.permute.xlu0 %901 }
 0x3bd   : > { %v1649_v52 = vsel %vm1647_vm13, %v1476_v30, %v1488_v37  ;;  %v2569_v56 = vmul.f32 %v2562_v28, %v902_v48  ;;  %1575 = vrot.lane.b32.xlu1 %v2520_v4, %s2187_s22  ;;  %1551 = vrot.lane.b32.xlu0 %v2520_v4, %s2184_s19 }
 0x3c0   : > { %v1524_v23 = vpop.permute.xlu1 %1523  ;;  %v910_v2 = vpop.permute.xlu0 %909 }
 0x3c1   : > { %v2580_v5 = vmul.f32 %v2577_v62, %v910_v2  ;;  %1581 = vrot.lane.b32.xlu1 %v2461_v38, %s2179_s12  ;;  %1275 = vrot.lane.b32.xlu0 %v1243_v59, %s2175_s21 }
 0x3c3   : > { %3040 = vst [vmem:[#allocation9_spill] sm:$0xff] %v2580_v5 }
 0x3c4   : > { %v1536_v57 = vpop.permute.xlu1 %1535  ;;  %v918_v9 = vpop.permute.xlu0 %917 }
 0x3c5   : > { %v2590_v15 = vmul.f32 %v2587_v8, %v918_v9  ;;  %1587 = vrot.lane.b32.xlu1 %v2374_v39, %s2188_s23  ;;  %1277 = vrot.lane.b32.xlu0 %v1244_v7, %s2175_s21  ;;  %v1041_v7 = vrot.slane %v854_v1, %v2502_v55 }
 0x3c7   : > { %3041 = vst [vmem:[#allocation10_spill] sm:$0xff] %v2590_v15 }
 0x3c8   : > { %v2596_v17 = vpop.permute.xlu1 %1217  ;;  %v1500_v54 = vpop.permute.xlu0 %1499 }
 0x3c9   : > { %v1654_v6 = vsel %vm1652_vm14, %v1649_v52, %v1500_v54  ;;  %1593 = vrot.lane.b32.xlu1 %v2520_v4, %s2188_s23  ;;  %1279 = vrot.lane.b32.xlu0 %v1245_v16, %s2175_s21  ;;  %v1049_v54 = vcombine.high %v1041_v7, %v1041_v7 }
 0x3cc   : > { %v2602_v19 = vpop.permute.xlu1 %1221  ;;  %v1512_v22 = vpop.permute.xlu0 %1511 }
 0x3cd   : > { %v1659_v30 = vsel %vm1657_vm15, %v1654_v6, %v1512_v22  ;;  %1601 = vrot.lane.b32.xlu1 %v2380_v41, %s2189_s24  ;;  %1569 = vrot.lane.b32.xlu0 %v2374_v39, %s2187_s22  ;;  %v1057_v6 = vrot.slane %v1041_v7, %v2502_v55  ;;  %v1034_v7 = vcombine.high %v854_v1, %v854_v1  ;;  %v2677_v1 = vld [vmem:[%s3030_s3] sm:$0xff] }
 0x3ce   : > { %v1663_v60 = vsel %vm262_vm0, %v1659_v30, %v1524_v23 }
 0x3cf   : > { %v1668_v14 = vsel %vm1666_vm1, %v1663_v60, %v1536_v57  ;;  %v1079_v24 = vcombine.high %v1057_v6, %v1057_v6 }
 0x3d0   : > { %v2611_v31 = vpop.permute.xlu1 %1229  ;;  %v1548_v34 = vpop.permute.xlu0 %1547 }
 0x3d1   : > { %v1673_v37 = vsel %vm1671_vm2, %v1668_v14, %v1548_v34  ;;  %1605 = vrot.lane.b32.xlu1 %v2520_v4, %s2189_s24  ;;  %1573 = vrot.lane.b32.xlu0 %v2461_v38, %s2187_s22 }
 0x3d4   : > { %v2618_v48 = vpop.permute.xlu1 %1237  ;;  %v1560_v52 = vpop.permute.xlu0 %1559 }
 0x3d5   : > { %v2621_v59 = vsel %vm1676_vm3, %v1673_v37, %v1560_v52  ;;  %1613 = vrot.lane.b32.xlu1 %v2380_v41, %s2190_s25  ;;  %981 = vbcast.lane.b32.xlu0 %v2444_v12, 320 }
 0x3d8   : > { %v2628_v23 = vpop.permute.xlu1 %1241  ;;  %v2630_v2 = vpop.permute.xlu0 %1213 }
 0x3d9   : > { %1617 = vrot.lane.b32.xlu1 %v2520_v4, %s2190_s25  ;;  %1583 = vrot.lane.b32.xlu0 %v2520_v4, %s2179_s12 }
 0x3dc   : > { %v596_v57 = vpop.permute.xlu1 %595  ;;  %v2637_v9 = vpop.permute.xlu0 %1225 }
 0x3dd   : > { %v600_v12 = vsel %vm493_vm7, %v2452_v18, %v596_v57  ;;  %1625 = vrot.lane.b32.xlu1 %v2380_v41, %s2191_s26  ;;  %1589 = vrot.lane.b32.xlu0 %v2380_v41, %s2188_s23  ;;  %v1071_v57 = vrot.slane %v1049_v54, %v2502_v55 }
 0x3de   : > { %v652_v33 = vcombine.high %v600_v12, %v600_v12  ;;  %v659_v16 = vrot.slane %v600_v12, %v2502_v55  ;;  %v2663_v12 = vrot.slane %v1057_v6, %v2396_v44 }
 0x3e0   : > { %v666_v22 = vrot.slane %v652_v33, %v2502_v55  ;;  %v667_v30 = vcombine.high %v659_v16, %v659_v16  ;;  %v2649_v60 = vrot.slane %v659_v16, %v2502_v55  ;;  %v2651_v18 = vpop.permute.xlu0 %1233 }
 0x3e1   : > { %1629 = vrot.lane.b32.xlu1 %v2520_v4, %s2191_s26  ;;  %1591 = vrot.lane.b32.xlu0 %v2461_v38, %s2188_s23  ;;  %s197_s23 = scalar_lea.vmem %s3031_s4, %s2005_s9 }
 0x3e2   : > { %v668_v14 = vcombine.high %v666_v22, %v666_v22  ;;  %v682_v34 = vrot.slane %v666_v22, %v2502_v55  ;;  %v689_v37 = vrot.slane %v667_v30, %v2502_v55  ;;  %v697_v52 = vcombine.high %v2649_v60, %v2649_v60 }
 0x3e4   : > { %v696_v33 = vrot.slane %v668_v14, %v2502_v55  ;;  %v698_v16 = vcombine.high %v682_v34, %v682_v34  ;;  %v699_v29 = vcombine.high %v689_v37, %v689_v37  ;;  %v740_v25 = vrot.slane %v689_v37, %v2396_v44  ;;  %v926_v26 = vpop.permute.xlu0 %925 }
 0x3e5   : > { %v744_v22 = vrot.slane %v697_v52, %v2396_v44  ;;  %v752_v30 = vrot.slane %v682_v34, %v2396_v44  ;;  %v2670_v15 = vmul.f32 %v2663_v12, %v926_v26  ;;  %1637 = vrot.lane.b32.xlu1 %v2380_v41, %s2192_s27  ;;  %1599 = vrot.lane.b32.xlu0 %v2374_v39, %s2189_s24 }
 0x3e6   : > { %v700_v54 = vcombine.high %v696_v33, %v696_v33  ;;  %v748_v14 = vrot.slane %v699_v29, %v2396_v44  ;;  %v756_v6 = vrot.slane %v696_v33, %v2396_v44  ;;  %v760_v37 = vrot.slane %v698_v16, %v2396_v44 }
 0x3e7   : > { %3042 = vst [vmem:[#allocation11_spill] sm:$0xff] %v2670_v15  ;;  %v1246_v26 = vmul.f32 %v2505_v58, %v2537_v13  ;;  %v2687_v34 = vmul.f32 %v740_v25, %v2677_v1  ;;  %v2690_v52 = vmul.f32 %v744_v22, %v2677_v1  ;;  %v2693_v15 = vmul.f32 %v752_v30, %v2677_v1 }
 0x3e8   : > { %v764_v29 = vrot.slane %v700_v54, %v2396_v44  ;;  %v2697_v33 = vmul.f32 %v748_v14, %v2677_v1  ;;  %v2700_v16 = vmul.f32 %v756_v6, %v2677_v1  ;;  %v2703_v5 = vmul.f32 %v760_v37, %v2677_v1  ;;  %v934_v58 = vpop.permute.xlu0 %933 }
 0x3e9   : > { %v1122_v25 = vrot.slane %v1071_v57, %v2396_v44  ;;  %1281 = vrot.lane.b32.xlu1 %v1246_v26, %s2175_s21  ;;  %v1048_v13 = vrot.slane %v1034_v7, %v2502_v55  ;;  %1603 = vrot.lane.b32.xlu0 %v2461_v38, %s2189_s24  ;;  %v1247_v30 = vmul.f32 %v2512_v63, %v2552_v27 }
 0x3ea   : > { %3043 = vst [vmem:[#allocation12_spill] sm:$0xff] %v2703_v5  ;;  %v2709_v22 = vmul.f32 %v764_v29, %v2677_v1  ;;  %v1126_v54 = vrot.slane %v1079_v24, %v2396_v44  ;;  %v1081_v14 = vcombine.high %v1071_v57, %v1071_v57  ;;  %v1248_v7 = vmul.f32 %v2510_v61, %v2562_v28 }
 0x3eb   : > { %v2716_v6 = vmul.f32 %v1122_v25, %v934_v58  ;;  %v1064_v26 = vrot.slane %v1048_v13, %v2502_v55  ;;  %v1050_v29 = vcombine.high %v1048_v13, %v1048_v13  ;;  %v1249_v57 = vmul.f32 %v2514_v0, %v2577_v62 }
 0x3ec   : > { %v942_v37 = vpop.permute.xlu0 %941  ;;  %v1130_v63 = vrot.slane %v1081_v14, %v2396_v44  ;;  %v1250_v13 = vmul.f32 %v2518_v3, %v2587_v8  ;;  %v1252_v3 = vmul.f32 %v2596_v17, %v1122_v25 }
 0x3ed   : > { %v2718_v5 = vmul.f32 %v1126_v54, %v942_v37  ;;  %1283 = vrot.lane.b32.xlu1 %v1247_v30, %s2175_s21  ;;  %1611 = vrot.lane.b32.xlu0 %v2374_v39, %s2190_s25  ;;  %v1134_v58 = vrot.slane %v1064_v26, %v2396_v44  ;;  %v1078_v61 = vrot.slane %v1050_v29, %v2502_v55 }
 0x3ee   : > { %v1080_v14 = vcombine.high %v1064_v26, %v1064_v26  ;;  %v1251_v29 = vmul.f32 %v2630_v2, %v2663_v12  ;;  %v1253_v2 = vmul.f32 %v2602_v19, %v1126_v54  ;;  %v1254_v17 = vmul.f32 %v2637_v9, %v1130_v63 }
 0x3ef   : > { %v1138_v37 = vrot.slane %v1078_v61, %v2396_v44  ;;  %v1255_v19 = vmul.f32 %v2611_v31, %v1134_v58  ;;  %v1082_v31 = vcombine.high %v1078_v61, %v1078_v61 }
 0x3f0   : > { %v950_v24 = vpop.permute.xlu0 %949  ;;  %v1142_v62 = vrot.slane %v1080_v14, %v2396_v44 }
 0x3f1   : > { %v2727_v27 = vmul.f32 %v1130_v63, %v950_v24  ;;  %1285 = vrot.lane.b32.xlu1 %v1248_v7, %s2175_s21  ;;  %1615 = vrot.lane.b32.xlu0 %v2461_v38, %s2190_s25 }
 0x3f4   : > { %v958_v28 = vpop.permute.xlu0 %957 }
 0x3f5   : > { %v2736_v30 = vmul.f32 %v1134_v58, %v958_v28  ;;  %1287 = vrot.lane.b32.xlu1 %v1249_v57, %s2175_s21  ;;  %1623 = vrot.lane.b32.xlu0 %v2374_v39, %s2191_s26  ;;  %v2000_v28 = vld [vmem:[%s3030_s3 + $0x32] ss:$0 sm:$0xff] }
 0x3f8   : > { %v966_v7 = vpop.permute.xlu0 %965 }
 0x3f9   : > { %v2744_v0 = vmul.f32 %v1138_v37, %v966_v7  ;;  %1289 = vrot.lane.b32.xlu1 %v1250_v13, %s2175_s21  ;;  %1627 = vrot.lane.b32.xlu0 %v2461_v38, %s2191_s26  ;;  %v1818_v7 = vmul.f32 %v2000_v28, %v2364_v36  ;;  %v1256_v36 = vmul.f32 %v2651_v18, %v1138_v37 }
 0x3fa   : > { %v1257_v18 = vmul.f32 %v2618_v48, %v1142_v62 }
 0x3fc   : > { %v974_v24 = vpop.permute.xlu0 %973 }
 0x3fd   : > { %v2752_v57 = vmul.f32 %v1142_v62, %v974_v24  ;;  %1291 = vrot.lane.b32.xlu1 %v1251_v29, %s2175_s21  ;;  %1635 = vrot.lane.b32.xlu0 %v2374_v39, %s2192_s27 }
 0x3ff   : > { %v1478_v8 = vpop.permute.xlu1 %1477 }
 0x400   : > { %v594_v26 = vpop.permute.xlu0 %593 }
 0x401   : > { %1293 = vrot.lane.b32.xlu1 %v1252_v3, %s2175_s21  ;;  %1639 = vrot.lane.b32.xlu0 %v2461_v38, %s2192_s27  ;;  %v2779_v9 = vsel %vm493_vm7, %v2467_v42, %v594_v26  ;;  %v2791_v42 = vrot.slane %v1082_v31, %v2396_v44 }
 0x403   : > { %v1490_v12 = vpop.permute.xlu1 %1489  ;;  %v1258_v61 = vmul.f32 %v2628_v23, %v2791_v42 }
 0x404   : > { %v1650_v13 = vsel %vm1647_vm13, %v1478_v8, %v1490_v12  ;;  %v1514_v14 = vpop.permute.xlu0 %1513 }
 0x405   : > { %1295 = vrot.lane.b32.xlu1 %v1253_v2, %s2175_s21  ;;  %1822 = vrot.lane.b32.xlu0 %v1818_v7, %s2175_s21 }
 0x407   : > { %v1502_v25 = vpop.permute.xlu1 %1501 }
 0x408   : > { %v1655_v29 = vsel %vm1652_vm14, %v1650_v13, %v1502_v25  ;;  %v1526_v24 = vpop.permute.xlu0 %1525 }
 0x409   : > { %1297 = vrot.lane.b32.xlu1 %v1254_v17, %s2175_s21  ;;  %v1660_v54 = vsel %vm1657_vm15, %v1655_v29, %v1514_v14  ;;  %v610_v14 = vrot.slane %v2779_v9, %v2502_v55  ;;  %v1819_v29 = vmul.f32 %v2000_v28, %v2362_v35 }
 0x40a   : > { %v1664_v8 = vsel %vm262_vm0, %v1660_v54, %v1526_v24 }
 0x40b   : > { %v1538_v3 = vpop.permute.xlu1 %1537  ;;  %v626_v37 = vrot.slane %v610_v14, %v2502_v55  ;;  %v618_v26 = vcombine.high %v610_v14, %v610_v14 }
 0x40c   : > { %v1669_v63 = vsel %vm1666_vm1, %v1664_v8, %v1538_v3  ;;  %v1562_v12 = vpop.permute.xlu0 %1561 }
 0x40d   : > { %1299 = vrot.lane.b32.xlu1 %v1255_v19, %s2175_s21  ;;  %v704_v7 = vrot.slane %v626_v37, %v2396_v44  ;;  %v2800_v17 = vrot.slane %v618_v26, %v2502_v55  ;;  %v648_v24 = vcombine.high %v626_v37, %v626_v37 }
 0x40f   : > { %v1550_v2 = vpop.permute.xlu1 %1549  ;;  %v781_v48 = vmul.f32 %v704_v7, %v2677_v1  ;;  %v708_v23 = vrot.slane %v2800_v17, %v2396_v44  ;;  %v712_v8 = vrot.slane %v648_v24, %v2396_v44 }
 0x410   : > { %v1674_v13 = vsel %vm1671_vm2, %v1669_v63, %v1550_v2 }
 0x411   : > { %1301 = vrot.lane.b32.xlu1 %v1256_v36, %s2175_s21  ;;  %v2785_v58 = vsel %vm1676_vm3, %v1674_v13, %v1562_v12  ;;  %v797_v19 = vmul.f32 1.442695, %v781_v48  ;;  %v782_v36 = vmul.f32 %v708_v23, %v2677_v1  ;;  %v783_v35 = vmul.f32 %v712_v8, %v2677_v1 }
 0x413   : > { %2126 = vpow2.f32 %v797_v19  ;;  %v799_v28 = vmul.f32 1.442695, %v782_v36 }
 0x415   : > { %1303 = vrot.lane.b32.xlu1 %v1257_v18, %s2175_s21  ;;  %2128 = vpow2.f32 %v799_v28 }
 0x419   : > { %1305 = vrot.lane.b32.xlu1 %v1258_v61, %s2175_s21  ;;  %v801_v61 = vmul.f32 1.442695, %v783_v35 }
 0x41b   : > { %2130 = vpow2.f32 %v801_v61  ;;  %v603_v61 = vcombine.high %v2779_v9, %v2779_v9 }
 0x41d   : > { %1641 = vrot.lane.b32.xlu1 %v2520_v4, %s2192_s27  ;;  %v2127_v24 = vpop.eup %2126 }
 0x41e   : > { %v1356_v8 = vmul.f32 0.0, %v2127_v24 }
 0x41f   : > { %v1516_v62 = vpop.permute.xlu1 %1515  ;;  %v1480_v25 = vpop.permute.xlu0 %1479 }
 0x421   : > { %1824 = vrot.lane.b32.xlu1 %v1819_v29, %s2175_s21 }
 0x423   : > { %v1528_v54 = vpop.permute.xlu1 %1527  ;;  %v1492_v3 = vpop.permute.xlu0 %1491 }
 0x424   : > { %v1651_v63 = vsel %vm1647_vm13, %v1480_v25, %v1492_v3 }
 0x427   : > { %v1564_v2 = vpop.permute.xlu1 %1563  ;;  %v1504_v12 = vpop.permute.xlu0 %1503 }
 0x428   : > { %v1656_v13 = vsel %vm1652_vm14, %v1651_v63, %v1504_v12  ;;  %v2129_v12 = vpop.eup %2128 }
 0x429   : > { %v1661_v31 = vsel %vm1657_vm15, %v1656_v13, %v1516_v62 }
 0x42a   : > { %v1665_v14 = vsel %vm262_vm0, %v1661_v31, %v1528_v54 }
 0x42b   : > { %v1572_v18 = vpop.permute.xlu1 %1571  ;;  %v1540_v37 = vpop.permute.xlu0 %1539 }
 0x42c   : > { %v1682_v26 = vsel %vm493_vm7, %v2621_v59, %v1572_v18  ;;  %v1670_v7 = vsel %vm1666_vm1, %v1665_v14, %v1540_v37  ;;  %v1163_v59 = vmul.f32 %v2565_v49, %v2528_v10  ;;  %v2131_v14 = vpop.eup %2130 }
 0x42d   : > { %v1687_v48 = vsel %vm1685_vm4, %v1682_v26, %v2520_v4 }
 0x42e   : > { %v2823_v25 = vsel %vm1690_vm5, %v1687_v48, %v2380_v41 }
 0x42f   : > { %v1576_v62 = vpop.permute.xlu1 %1575  ;;  %v1552_v29 = vpop.permute.xlu0 %1551 }
 0x430   : > { %v1675_v23 = vsel %vm1671_vm2, %v1670_v7, %v1552_v29  ;;  %v650_v29 = vcombine.high %v2800_v17, %v2800_v17 }
 0x431   : > { %v1680_v19 = vsel %vm1676_vm3, %v1675_v23, %v1564_v2 }
 0x432   : > { %v1684_v54 = vsel %vm493_vm7, %v1680_v19, %v1576_v62 }
 0x433   : > { %v1582_v3 = vpop.permute.xlu1 %1581  ;;  %v1276_v36 = vpop.permute.xlu0 %1275 }
 0x434   : > { %v1323_v63 = vsel %vm493_vm7, %v1163_v59, %v1276_v36 }
 0x435   : > { %v1358_v41 = vadd.f32 %v1356_v8, %v1323_v63 }
 0x437   : > { %v2831_v35 = vpop.permute.xlu1 %1587  ;;  %v1362_v28 = vmul.f32 %v2129_v12, %v1358_v41  ;;  %v1278_v13 = vpop.permute.xlu0 %1277 }
 0x438   : > { %v1324_v31 = vsel %vm493_vm7, %v2530_v11, %v1278_v13  ;;  %v617_v11 = vrot.slane %v603_v61, %v2502_v55 }
 0x439   : > { %v1365_v2 = vadd.f32 %v1362_v28, %v1324_v31 }
 0x43a   : > { %v619_v19 = vcombine.high %v617_v11, %v617_v11  ;;  %v633_v9 = vrot.slane %v617_v11, %v2502_v55 }
 0x43b   : > { %v1594_v18 = vpop.permute.xlu1 %1593  ;;  %v1369_v10 = vmul.f32 %v2131_v14, %v1365_v2  ;;  %v1280_v49 = vpop.permute.xlu0 %1279  ;;  %v1746_v37 = vpack.c.bf16 %v1365_v2, %v1358_v41 }
 0x43c   : > { %v1325_v26 = vsel %vm493_vm7, %v2541_v20, %v1280_v49  ;;  %v716_v20 = vrot.slane %v650_v29, %v2396_v44  ;;  %v647_v41 = vrot.slane %v619_v19, %v2502_v55  ;;  %v720_v17 = vrot.slane %v633_v9, %v2396_v44 }
 0x43d   : > { %v2839_v7 = vadd.f32 %v1369_v10, %v1325_v26  ;;  %2042 = vmatprep.subr.bf16.mxu1 %v1746_v37  ;;  %v649_v28 = vcombine.high %v633_v9, %v633_v9 }
 0x43e   : > { %2043 = vmatpush3.bf16.msra.mxu1 %v1746_v37  ;;  %v784_v12 = vmul.f32 %v716_v20, %v2677_v1  ;;  %v724_v2 = vrot.slane %v647_v41, %v2396_v44  ;;  %v651_v49 = vcombine.high %v647_v41, %v647_v41  ;;  %v736_v41 = vrot.slane %v2649_v60, %v2396_v44 }
 0x43f   : > { %v2841_v48 = vpop.permute.xlu1 %1601  ;;  %v2843_v62 = vpop.permute.xlu0 %1569  ;;  %v728_v37 = vrot.slane %v649_v28, %v2396_v44 }
 0x440   : > { %v786_v29 = vmul.f32 %v724_v2, %v2677_v1 }
 0x441   : > { %v787_v9 = vmul.f32 %v728_v37, %v2677_v1 }
 0x442   : > { %v807_v20 = vmul.f32 1.442695, %v786_v29 }
 0x443   : > { %v1606_v24 = vpop.permute.xlu1 %1605  ;;  %v1574_v23 = vpop.permute.xlu0 %1573 }
 0x444   : > { %v1683_v59 = vsel %vm493_vm7, %v2785_v58, %v1574_v23  ;;  %v785_v58 = vmul.f32 %v720_v17, %v2677_v1 }
 0x445   : > { %v2853_v8 = vsel %vm1685_vm4, %v1683_v59, %v1582_v3  ;;  %v803_v3 = vmul.f32 1.442695, %v784_v12  ;;  %v809_v12 = vmul.f32 1.442695, %v787_v9 }
 0x446   : > { %v805_v23 = vmul.f32 1.442695, %v785_v58 }
 0x447   : > { %v2855_v36 = vpop.permute.xlu1 %1613  ;;  %v2857_v63 = vpop.permute.xlu0 %981  ;;  %2132 = vpow2.f32 %v803_v3 }
 0x448   : > { %2134 = vpow2.f32 %v805_v23 }
 0x449   : > { %2136 = vpow2.f32 %v807_v20 }
 0x44a   : > { %2138 = vpow2.f32 %v809_v12 }
 0x44b   : > { %v1618_v13 = vpop.permute.xlu1 %1617  ;;  %v1584_v31 = vpop.permute.xlu0 %1583 }
 0x44c   : > { %v1689_v14 = vsel %vm1685_vm4, %v1684_v54, %v1584_v31 }
 0x44d   : > { %v1694_v10 = vsel %vm1690_vm5, %v1689_v14, %v2520_v4 }
 0x44e   : > { %v1699_v55 = vsel %vm1695_vm8, %v1694_v10, %v1594_v18  ;;  %v732_v18 = vrot.slane %v651_v49, %v2396_v44 }
 0x44f   : > { %v2869_v61 = vpop.permute.xlu1 %1625  ;;  %v1590_v26 = vpop.permute.xlu0 %1589  ;;  %v1704_v11 = vsel %vm1700_vm6, %v1699_v55, %v1606_v24  ;;  %v1648_v24 = vsel %vm1647_vm13, %v2463_v40, %v2473_v45  ;;  %v789_v45 = vmul.f32 %v736_v41, %v2677_v1 }
 0x450   : > { %v2874_v54 = vsel %vm1705_vm9, %v1704_v11, %v1618_v13  ;;  %v788_v17 = vmul.f32 %v732_v18, %v2677_v1  ;;  %v1653_v31 = vsel %vm1652_vm14, %v1648_v24, %v2471_v43 }
 0x451   : > { %v2133_v13 = vpop.eup %2132  ;;  %v1658_v2 = vsel %vm1657_vm15, %v1653_v31, %v2479_v46  ;;  %v813_v1 = vmul.f32 1.442695, %v789_v45 }
 0x452   : > { %v1376_v40 = vmul.f32 %v2133_v13, %v2839_v7  ;;  %v811_v44 = vmul.f32 1.442695, %v788_v17  ;;  %v2135_v10 = vpop.eup %2134  ;;  %v1662_v43 = vsel %vm262_vm0, %v1658_v2, %v2481_v47  ;;  %vm1710_vm0 = vcmask 916480  }
 0x453   : > { %v2876_v4 = vpop.permute.xlu1 %1629  ;;  %v2878_v19 = vpop.permute.xlu0 %1591  ;;  %v1667_v46 = vsel %vm1666_vm1, %v1662_v43, %v2489_v51 }
 0x454   : > { %2140 = vpow2.f32 %v811_v44  ;;  %v2137_v23 = vpop.eup %2136  ;;  %v1672_v18 = vsel %vm1671_vm2, %v1667_v46, %v2487_v50  ;;  %v1697_v50 = vsel %vm1695_vm8, %v2823_v25, %v1590_v26 }
 0x455   : > { %v1677_v47 = vsel %vm1676_vm3, %v1672_v18, %v2495_v53  ;;  %2142 = vpow2.f32 %v813_v1  ;;  %v2139_v17 = vpop.eup %2138 }
 0x457   : > { %v2885_v59 = vpop.permute.xlu1 %1637  ;;  %v2890_v28 = vpop.permute.xlu0 %1599 }
 0x45b   : > { %v1282_v58 = vpop.permute.xlu1 %1281  ;;  %v2900_v3 = vpop.permute.xlu0 %1603 }
 0x45c   : > { %v1326_v60 = vsel %vm493_vm7, %v2544_v21, %v1282_v58 }
 0x45d   : > { %v1379_v14 = vadd.f32 %v1376_v40, %v1326_v60  ;;  %v3045_v60 = vld [vmem:[#allocation10_spill] sm:$0xff] }
 0x45e   : > { %v2141_v25 = vpop.eup %2140 }
 0x45f   : > { %v1284_v55 = vpop.permute.xlu1 %1283  ;;  %v1383_v49 = vmul.f32 %v2135_v10, %v1379_v14  ;;  %v1747_v37 = vpack.c.bf16 %v1379_v14, %v2839_v7  ;;  %v1612_v29 = vpop.permute.xlu0 %1611  ;;  %v815_v7 = vmul.f32 1.442695, %v2687_v34  ;;  %v817_v34 = vmul.f32 1.442695, %v2690_v52 }
 0x460   : > { %v1327_v11 = vsel %vm493_vm7, %v2555_v32, %v1284_v55  ;;  %v1681_v32 = vsel %vm493_vm7, %v1677_v47, %v2843_v62  ;;  %v1702_v62 = vsel %vm1700_vm6, %v1697_v50, %v2841_v48  ;;  %v819_v48 = vmul.f32 1.442695, %v2697_v33  ;;  %v2143_v46 = vpop.eup %2142  ;;  %v1721_v33 = vld [vmem:[%s3030_s3 + $0x10] sm:$0xff] }
 0x461   : > { %v1386_v21 = vadd.f32 %v1383_v49, %v1327_v11  ;;  %2044 = vmatprep.subr.bf16.mxu1 %v1747_v37  ;;  %v1686_v53 = vsel %vm1685_vm4, %v1681_v32, %v2461_v38  ;;  %2144 = vpow2.f32 %v815_v7  ;;  %v1707_v45 = vsel %vm1705_vm9, %v1702_v62, %v2855_v36 }
 0x462   : > { %2045 = vmatpush3.bf16.msra.mxu1 %v1747_v37  ;;  %v1691_v26 = vsel %vm1690_vm5, %v1686_v53, %v2374_v39  ;;  %2146 = vpow2.f32 %v817_v34  ;;  %v1712_v55 = vsel %vm1710_vm0, %v1707_v45, %v2869_v61  ;;  %v821_v61 = vmul.f32 1.442695, %v2693_v15  ;;  %v3047_v34 = vld [vmem:[#allocation12_spill] sm:$0xff] }
 0x463   : > { %v1286_v51 = vpop.permute.xlu1 %1285  ;;  %v1390_v9 = vmul.f32 %v2137_v23, %v1386_v21  ;;  %v2918_v24 = vpop.permute.xlu0 %1615  ;;  %v1696_v43 = vsel %vm1695_vm8, %v1691_v26, %v2831_v35  ;;  %v1717_v49 = vsel %vm1715_vm10, %v1712_v55, %v2885_v59  ;;  %v1720_v35 = vld [vmem:[%s3030_s3 + $0x8] sm:$0xff]  ;;  %2148 = vpow2.f32 %v819_v48  ;;  %v3046_v23 = vld [vmem:[#allocation11_spill] sm:$0xff] }
 0x464   : > { %v1328_v20 = vsel %vm493_vm7, %v2569_v56, %v1286_v51  ;;  %v3044_v56 = vld [vmem:[#allocation9_spill] sm:$0xff]  ;;  %v1701_v36 = vsel %vm1700_vm6, %v1696_v43, %v2890_v28  ;;  %2150 = vpow2.f32 %v821_v61  ;;  %v823_v50 = vmul.f32 1.442695, %v2700_v16 }
 0x465   : > { %v1393_v41 = vadd.f32 %v1390_v9, %v1328_v20  ;;  %v1706_v37 = vsel %vm1705_vm9, %v1701_v36, %v1612_v29  ;;  %v1725_v9 = vmul.f32 %v1721_v33, %v1717_v49  ;;  %v825_v62 = vmul.f32 1.442695, %v3047_v34 }
 0x466   : > { %2152 = vpow2.f32 %v823_v50 }
 0x467   : > { %v1288_v12 = vpop.permute.xlu1 %1287  ;;  %v1397_v13 = vmul.f32 %v2139_v17, %v1393_v41  ;;  %v1748_v31 = vpack.c.bf16 %v1393_v41, %v1386_v21  ;;  %v1624_v58 = vpop.permute.xlu0 %1623  ;;  %2154 = vpow2.f32 %v825_v62 }
 0x468   : > { %v1329_v2 = vsel %vm493_vm7, %v3044_v56, %v1288_v12  ;;  %v1711_v28 = vsel %vm1710_vm0, %v1706_v37, %v1624_v58 }
 0x469   : > { %v1400_v40 = vadd.f32 %v1397_v13, %v1329_v2  ;;  %2046 = vmatprep.subr.bf16.mxu1 %v1748_v31 }
 0x46a   : > { %2047 = vmatpush3.bf16.msra.mxu1 %v1748_v31 }
 0x46b   : > { %v1290_v44 = vpop.permute.xlu1 %1289  ;;  %v1404_v52 = vmul.f32 %v2141_v25, %v1400_v40  ;;  %v2936_v10 = vpop.permute.xlu0 %1627 }
 0x46c   : > { %v1330_v14 = vsel %vm493_vm7, %v3045_v60, %v1290_v44  ;;  %v2145_v29 = vpop.eup %2144 }
 0x46d   : > { %v1407_v39 = vadd.f32 %v1404_v52, %v1330_v14  ;;  %v2147_v53 = vpop.eup %2146 }
 0x46e   : > { %v2149_v58 = vpop.eup %2148 }
 0x46f   : > { %v1292_v1 = vpop.permute.xlu1 %1291  ;;  %v1411_v11 = vmul.f32 %v2143_v46, %v1407_v39  ;;  %v1749_v21 = vpack.c.bf16 %v1407_v39, %v1400_v40  ;;  %v1636_v47 = vpop.permute.xlu0 %1635 }
 0x470   : > { %v1331_v18 = vsel %vm493_vm7, %v3046_v23, %v1292_v1  ;;  %v1716_v59 = vsel %vm1715_vm10, %v1711_v28, %v1636_v47  ;;  %v2151_v45 = vpop.eup %2150 }
 0x471   : > { %v1414_v51 = vadd.f32 %v1411_v11, %v1331_v18  ;;  %2048 = vmatprep.subr.bf16.mxu1 %v1749_v21  ;;  %v1724_v7 = vmul.f32 %v1720_v35, %v1716_v59  ;;  %v2153_v14 = vpop.eup %2152  ;;  %v1178_v11 = vmul.f32 %v2791_v42, %v2857_v63  ;;  %v1722_v42 = vld [vmem:[%s3030_s3 + $0x18] sm:$0xff] }
 0x472   : > { %2049 = vmatpush3.bf16.msra.mxu1 %v1749_v21 }
 0x473   : > { %v1294_v32 = vpop.permute.xlu1 %1293  ;;  %v1418_v20 = vmul.f32 %v2145_v29, %v1414_v51  ;;  %v1728_v41 = vpack.c.bf16 %v1725_v9, %v1724_v7  ;;  %v1640_v21 = vpop.permute.xlu0 %1639  ;;  %v3048_v29 = vld [vmem:[#allocation5_spill] sm:$0xff]  ;;  %v3049_v7 = vld [vmem:[#allocation7_spill] sm:$0xff] }
 0x474   : > { %v1332_v15 = vsel %vm493_vm7, %v2716_v6, %v1294_v32  ;;  %v827_v6 = vmul.f32 1.442695, %v2709_v22  ;;  %v1830_v9 = vsub.f32 0.0, %v3048_v29  ;;  %v1831_v32 = vsub.f32 0.0, %v3049_v7 }
 0x475   : > { %v1421_v17 = vadd.f32 %v1418_v20, %v1332_v15  ;;  %2058 = vmatprep.mubr.bf16.mxu1 %v1728_v41 }
 0x476   : > { %2156 = vpow2.f32 %v827_v6  ;;  %v1832_v20 = vmul.f32 1.442695, %v1830_v9  ;;  %v1834_v50 = vmul.f32 1.442695, %v1831_v32 }
 0x477   : > { %v1296_v12 = vpop.permute.xlu1 %1295  ;;  %v1425_v13 = vmul.f32 %v2147_v53, %v1421_v17  ;;  %v1750_v31 = vpack.c.bf16 %v1421_v17, %v1414_v51  ;;  %v1852_v17 = vld [vmem:[%s3030_s3 + $0x28] sm:$0xff]  ;;  %v1823_v6 = vpop.permute.xlu0 %1822 }
 0x478   : > { %v1333_v56 = vsel %vm493_vm7, %v2718_v5, %v1296_v12  ;;  %2158 = vpow2.f32 %v1832_v20  ;;  %v1854_v53 = vpack.c.bf16 %v1852_v17, %v1852_v17 }
 0x479   : > { %v1428_v2 = vadd.f32 %v1425_v13, %v1333_v56  ;;  %2050 = vmatprep.subr.bf16.mxu1 %v1750_v31  ;;  %2160 = vpow2.f32 %v1834_v50 }
 0x47a   : > { %2051 = vmatpush3.bf16.msra.mxu1 %v1750_v31  ;;  %v1859_v12 = vsel %vm493_vm7, %v1854_v53, 0 }
 0x47b   : > { %v1298_v16 = vpop.permute.xlu1 %1297  ;;  %v1432_v40 = vmul.f32 %v2149_v58, %v1428_v2  ;;  %2063 = vmatpush3.bf16.xpose.msra.mxu0 %v1859_v12 }
 0x47c   : > { %v1334_v25 = vsel %vm493_vm7, %v2727_v27, %v1298_v16  ;;  %v2155_v27 = vpop.eup %2154 }
 0x47d   : > { %v1435_v26 = vadd.f32 %v1432_v40, %v1334_v25  ;;  %v2002_v40 = vld [vmem:[%s3030_s3 + $0x33] ss:$0 sm:$0xff] }
 0x47f   : > { %v1300_v44 = vpop.permute.xlu1 %1299  ;;  %v1439_v52 = vmul.f32 %v2151_v45, %v1435_v26  ;;  %v1751_v48 = vpack.c.bf16 %v1435_v26, %v1428_v2 }
 0x480   : > { %v1335_v5 = vsel %vm493_vm7, %v2736_v30, %v1300_v44  ;;  %v1693_v30 = vsel %vm1690_vm5, %v2853_v8, %v2461_v38  ;;  %v2157_v1 = vpop.eup %2156 }
 0x481   : > { %v1442_v60 = vadd.f32 %v1439_v52, %v1335_v5  ;;  %2052 = vmatprep.subr.bf16.mxu1 %v1751_v48 }
 0x482   : > { %2053 = vmatpush3.bf16.msra.mxu1 %v1751_v48  ;;  %v2159_v15 = vpop.eup %2158 }
 0x483   : > { %v1302_v43 = vpop.permute.xlu1 %1301  ;;  %v1446_v39 = vmul.f32 %v2153_v14, %v1442_v60 }
 0x484   : > { %v1336_v22 = vsel %vm493_vm7, %v2744_v0, %v1302_v43  ;;  %v1698_v0 = vsel %vm1695_vm8, %v1693_v30, %v2878_v19  ;;  %v1723_v19 = vld [vmem:[%s3030_s3 + $0x20] sm:$0xff] }
 0x485   : > { %v1449_v46 = vadd.f32 %v1446_v39, %v1336_v22  ;;  %v1703_v35 = vsel %vm1700_vm6, %v1698_v0, %v2900_v3  ;;  %v1714_v3 = vsel %vm1710_vm0, %v2874_v54, %v2876_v4  ;;  %v2161_v54 = vpop.eup %2160  ;;  %v1836_v4 = vadd.f32 1.0, %v2159_v15 }
 0x486   : > { %v1708_v28 = vsel %vm1705_vm9, %v1703_v35, %v2918_v24  ;;  %v1837_v41 = vadd.f32 1.0, %v2161_v54 }
 0x487   : > { %v1304_v55 = vpop.permute.xlu1 %1303  ;;  %v1453_v36 = vmul.f32 %v2155_v27, %v1449_v46  ;;  %v1752_v33 = vpack.c.bf16 %v1449_v46, %v1442_v60  ;;  %v1713_v8 = vsel %vm1710_vm0, %v1708_v28, %v2936_v10  ;;  %2162 = vrcp.f32 %v1836_v4 }
 0x488   : > { %v1337_v49 = vsel %vm493_vm7, %v2752_v57, %v1304_v55  ;;  %v1718_v63 = vsel %vm1715_vm10, %v1713_v8, %v1640_v21  ;;  %2164 = vrcp.f32 %v1837_v41  ;;  %v3050_v55 = vld [vmem:[#allocation6_spill] sm:$0xff] }
 0x489   : > { %v1456_v37 = vadd.f32 %v1453_v36, %v1337_v49  ;;  %2054 = vmatprep.subr.bf16.mxu1 %v1752_v33  ;;  %v1726_v10 = vmul.f32 %v1722_v42, %v1718_v63 }
 0x48a   : > { %2055 = vmatpush3.bf16.msra.mxu1 %v1752_v33 }
 0x48b   : > { %v1306_v61 = vpop.permute.xlu1 %1305  ;;  %v1460_v57 = vmul.f32 %v2157_v1, %v1456_v37 }
 0x48c   : > { %v1338_v38 = vsel %vm493_vm7, %v1178_v11, %v1306_v61 }
 0x48d   : > { %v1463_v23 = vadd.f32 %v1460_v57, %v1338_v38 }
 0x48f   : > { %v1642_v24 = vpop.permute.xlu1 %1641  ;;  %v1753_v18 = vpack.c.bf16 %v1463_v23, %v1456_v37  ;;  %v3051_v37 = vld [vmem:[#allocation8_spill] sm:$0xff] }
 0x490   : > { %v1719_v47 = vsel %vm1715_vm10, %v1714_v3, %v1642_v24 }
 0x491   : > { %v1727_v51 = vmul.f32 %v1723_v19, %v1719_v47  ;;  %2056 = vmatprep.subr.bf16.mxu1 %v1753_v18  ;;  %v2163_v13 = vpop.eup %2162 }
 0x492   : > { %2057 = vmatpush3.bf16.msra.mxu1 %v1753_v18  ;;  %v2165_v62 = vpop.eup %2164  ;;  %v1840_v58 = vmul.f32 %v2163_v13, %v3048_v29 }
 0x493   : > { %v1729_v59 = vpack.c.bf16 %v1727_v51, %v1726_v10  ;;  %v1841_v16 = vmul.f32 %v2165_v62, %v3049_v7  ;;  %v1825_v25 = vpop.permute.xlu1 %1824 }
 0x495   : > { %2059 = vmatmul.mubr.bf16.vlgmr.msra.gmra.mrb[4].mxu1 %v1729_v59 }
 0x568   : > { %v2060_v31 = vpop.f32.mrb[4].mxu1 }
 0x569   : > { %1805 = vrot.lane.b32.xlu0 %v2060_v31, %s2175_s21  ;;  %v1788_v34 = vpop.f32.mrb[5].mxu1 }
 0x56a   : > { %v2061_v56 = vpop.f32.mrb[6].mxu1 }
 0x56b   : > { %1807 = vrot.lane.b32.xlu1 %v2061_v56, %s2175_s21  ;;  %v1791_v2 = vpop.f32.mrb[7].mxu1 }
 0x56d   : > { %1844 = vrot.lane.b32.xlu0 %v1840_v58, %s2175_s21 }
 0x56f   : > { %1846 = vrot.lane.b32.xlu1 %v1841_v16, %s2175_s21 }
 0x571   : > { %1908 = vrot.lane.b32.xlu0 %v2002_v40, %s2175_s21 }
 0x5db   : > { %v1806_v26 = vpop.permute.xlu0 %1805 }
 0x5dc   : > { %v1811_v45 = vadd.f32 %v1806_v26, %v1788_v34 }
 0x5dd   : > { %v1808_v44 = vpop.permute.xlu1 %1807 }
 0x5de   : > { %v1812_v52 = vadd.f32 %v1808_v44, %v1791_v2  ;;  %v1828_v48 = vadd.f32 %v1823_v6, %v1811_v45 }
 0x5df   : > { %v1845_v5 = vpop.permute.xlu0 %1844 }
 0x5e0   : > { %v1829_v60 = vadd.f32 %v1825_v25, %v1812_v52  ;;  %v1850_v43 = vmul.f32 %v1845_v5, %v1828_v48 }
 0x5e1   : > { %v1847_v14 = vpop.permute.xlu1 %1846 }
 0x5e2   : > { %v1851_v39 = vmul.f32 %v1847_v14, %v1829_v60 }
 0x5e3   : > { %v1909_v27 = vpop.permute.xlu0 %1908 }
 0x5e4   : > { %v1853_v22 = vpack.c.bf16 %v1851_v39, %v1850_v43 }
 0x5e6   : > { %2065 = vmatmul.mubr.msk.bf16.vlgmr.msra.gmra.mrb[4].mxu0 %vm493_vm7, %v1853_v22 }
 0x6b9   : > { %v1895_v46 = vpop.f32.mrb[4].mxu0 }
 0x6ba   : > { %v1896_v36 = vadd.f32 %v1895_v46, %v3050_v55  ;;  %v2066_v33 = vpop.f32.mrb[5].mxu0 }
 0x6bb   : > { %v1898_v49 = vpop.f32.mrb[6].mxu0 }
 0x6bc   : > { %v1911_v30 = vadd.f32 %v1909_v27, %v1896_v36  ;;  %v1899_v1 = vadd.f32 %v1898_v49, %v3051_v37  ;;  %v2067_v11 = vpop.f32.mrb[7].mxu0 }
 0x6be   : > { %1913 = vst.msk [vmem:[%s197_s23] sm:$0xff] %vm1647_vm13, %v1911_v30  ;;  %v1912_v0 = vadd.f32 %v1909_v27, %v1899_v1 }
 0x6c0   : > { %1914 = vst.msk [vmem:[%s197_s23 + $0x8] sm:$0xff] %vm1647_vm13, %v1912_v0 }
 0x6c1 PF: > { %s14_s15 = sadd.s32 1, %s2172_s15  }
 0x6c2   : > { %p11_p4 = scmp.ge.s32.totalorder %s14_s15, 6  }
 0x6c4   :  { %13 = sbr.rel (!%p11_p4) target bundleno = 1 (0x1), region = 96 }

</bundles_post_ra>
